<compile_context>
chip_gen: v7x
topology: tpu7x:2x2x1
jax: 0.10.0
libtpu: 0.0.40
codegen_flags: <defaults>
</compile_context>

<pallas_src>
import functools
import math

import jax
import jax.numpy as jnp
from jax.experimental import pallas as pl
from jax.experimental.pallas import tpu as pltpu


# ----------------------------------------------------------------------------
# Fused forward kernel (one batch element per grid step)
# ----------------------------------------------------------------------------
def _layernorm(x, g, b, eps):
    mu = jnp.mean(x, axis=-1, keepdims=True)
    d = x - mu
    var = jnp.mean(d * d, axis=-1, keepdims=True)
    return d * jax.lax.rsqrt(var + eps) * g + b


def fused_forward_kernel(
    x_ref, pe_ref,
    emb_w_ref, emb_b_ref,
    wq_ref, wk_ref, wv_ref, bq_ref, bk_ref, bv_ref,
    wo_ref, bo_ref,
    ln1_g_ref, ln1_b_ref,
    ff1_w_ref, ff1_b_ref, ff2_w_ref, ff2_b_ref,
    ln2_g_ref, ln2_b_ref,
    l1_w_ref, l1_b_ref,
    l2_w_ref, l2_b_ref,
    l3_w_ref, l3_b_ref,
    l4_w_ref, l4_b_ref,
    l5_w_ref, l5_b_ref,
    outw_t_ref, outb_ref,
    o_ref,
    *, nhead, eps,
):
    f32 = jnp.float32
    S = x_ref.shape[1]
    E = emb_w_ref.shape[1]
    Dh = E // nhead
    scale = 1.0 / math.sqrt(Dh)

    def dense(t, w_ref, b_ref, relu=False):
        t = jnp.dot(t, w_ref[...], preferred_element_type=f32) + b_ref[...]
        return jnp.maximum(t, 0.0) if relu else t

    # --- input_embedding: Linear(1, E) as a broadcast multiply ---
    h = x_ref[0] * emb_w_ref[...] + emb_b_ref[...]            # (S, E)

    # --- positional encoding: pe indexed by the batch index (module quirk) ---
    h = h + pe_ref[0]                                         # (1, E) bcast
    # dropout -> identity (eval)

    # --- self-attention: all heads in-kernel, no HBM round trips ---
    q = dense(h, wq_ref, bq_ref)                              # (S, E)
    k = dense(h, wk_ref, bk_ref)
    v = dense(h, wv_ref, bv_ref)

    row = jax.lax.broadcasted_iota(jnp.int32, (S, S), 0)
    col = jax.lax.broadcasted_iota(jnp.int32, (S, S), 1)
    causal_bias = jnp.where(col > row, -1e30, 0.0).astype(f32)

    head_outs = []
    for hi in range(nhead):                                   # static loop
        lo = hi * Dh
        qh = q[:, lo:lo + Dh]
        kh = k[:, lo:lo + Dh]
        vh = v[:, lo:lo + Dh]
        s = jax.lax.dot_general(qh, kh, (((1,), (1,)), ((), ())),
                                preferred_element_type=f32) * scale
        s = s + causal_bias
        m = jnp.max(s, axis=-1, keepdims=True)
        p = jnp.exp(s - m)
        p = p * pl.reciprocal(jnp.sum(p, axis=-1, keepdims=True), approx=True)
        head_outs.append(jnp.dot(p, vh, preferred_element_type=f32))
    attn = jnp.concatenate(head_outs, axis=-1)                # (S, E)
    attn = dense(attn, wo_ref, bo_ref)

    # --- post-norm encoder layer ---
    h1 = _layernorm(h + attn, ln1_g_ref[...], ln1_b_ref[...], eps)
    ff = dense(dense(h1, ff1_w_ref, ff1_b_ref, relu=True), ff2_w_ref, ff2_b_ref)
    h2 = _layernorm(h1 + ff, ln2_g_ref[...], ln2_b_ref[...], eps)

    # --- MLP head on the flattened (1, S*E) row ---
    # Flatten expressed as a block matmul (avoids in-kernel sublane->lane
    # reshape): (1, S*E) @ (S*E, dff) == sum_s h2[s] @ l1_w[s*E:(s+1)*E].
    z = l1_b_ref[...]                                         # (1, dff)
    for si in range(S):                                       # static loop
        z = z + jnp.dot(h2[si:si + 1, :],
                        l1_w_ref[si * E:(si + 1) * E, :],
                        preferred_element_type=f32)
    z = jnp.maximum(z, 0.0)

    z = dense(z, l2_w_ref, l2_b_ref, relu=True)
    z = dense(z, l3_w_ref, l3_b_ref, relu=True)
    z = dense(z, l4_w_ref, l4_b_ref, relu=True)
    z = dense(z, l5_w_ref, l5_b_ref, relu=True)               # (1, dff//64)

    # outlayer (N=1): VPU dot-product against pre-transposed weight (1, dff//64)
    out = jnp.sum(z * outw_t_ref[...], axis=-1, keepdims=True) + outb_ref[...]
    o_ref[0] = out.astype(o_ref.dtype)


# ----------------------------------------------------------------------------
# Wrapper: single pallas_call for the whole forward pass
# ----------------------------------------------------------------------------
def forecasting_forward(x, p):
    B, S, _ = x.shape
    E = p["emb_w"].shape[1]
    H = p["nhead"]

    # Split the fused in-proj once outside the kernel (tiny, constant work);
    # avoids in-kernel lane-slicing of a (S, 3E) tile.
    wq, wk, wv = jnp.split(p["in_proj_w"], 3, axis=1)
    bq, bk, bv = jnp.split(p["in_proj_b"], 3, axis=1)

    weights = [
        p["emb_w"], p["emb_b"],
        wq, wk, wv, bq, bk, bv,
        p["out_proj_w"], p["out_proj_b"],
        p["ln1_g"], p["ln1_b"],
        p["ff1_w"], p["ff1_b"], p["ff2_w"], p["ff2_b"],
        p["ln2_g"], p["ln2_b"],
        p["l1_w"], p["l1_b"],
        p["l2_w"], p["l2_b"],
        p["l3_w"], p["l3_b"],
        p["l4_w"], p["l4_b"],
        p["l5_w"], p["l5_b"],
        p["out_w"].T, p["out_b"],
    ]

    def const_spec(a):
        nd = a.ndim
        return pl.BlockSpec(a.shape, lambda b, _nd=nd: (0,) * _nd)

    in_specs = [
        pl.BlockSpec((1, S, 1), lambda b: (b, 0, 0)),   # x: one batch row
        pl.BlockSpec((1, 1, E), lambda b: (b, 0, 0)),   # pe[b] (batch-indexed)
    ] + [const_spec(a) for a in weights]                # weights: VMEM-resident

    out = pl.pallas_call(
        functools.partial(fused_forward_kernel, nhead=H, eps=1e-5),
        out_shape=jax.ShapeDtypeStruct((B, 1, 1), jnp.float32),
        grid=(B,),
        in_specs=in_specs,
        out_specs=pl.BlockSpec((1, 1, 1), lambda b: (b, 0, 0)),
        compiler_params=pltpu.CompilerParams(
            dimension_semantics=("parallel",),          # batch across v7x TCs
        ),
    )(x, p["pe"], *weights)
    return out.reshape(B, 1)


# ----------------------------------------------------------------------------
# Pure-jnp reference (same math) for in-script verification
# ----------------------------------------------------------------------------
def reference_forward(x, p):
    B, S, _ = x.shape
    E = p["emb_w"].shape[1]
    H = p["nhead"]
    Dh = E // H

    h = x * p["emb_w"].reshape(1, 1, E) + p["emb_b"].reshape(1, 1, E)
    h = h + p["pe"][:B]
    hf = h.reshape(B * S, E)

    qkv = hf @ p["in_proj_w"] + p["in_proj_b"]
    q, k, v = jnp.split(qkv, 3, axis=-1)
    q = q.reshape(B, S, H, Dh).transpose(0, 2, 1, 3)
    k = k.reshape(B, S, H, Dh).transpose(0, 2, 1, 3)
    v = v.reshape(B, S, H, Dh).transpose(0, 2, 1, 3)
    mask = jnp.where(jnp.arange(S)[None, :] > jnp.arange(S)[:, None],
                     -jnp.inf, 0.0)
    s = jnp.einsum("bhqd,bhkd->bhqk", q, k) / math.sqrt(Dh) + mask
    pa = jax.nn.softmax(s, axis=-1)
    a = jnp.einsum("bhqk,bhkd->bhqd", pa, v).transpose(0, 2, 1, 3).reshape(B * S, E)
    a = a @ p["out_proj_w"] + p["out_proj_b"]

    def ln(t, g, b):
        mu = t.mean(-1, keepdims=True)
        var = ((t - mu) ** 2).mean(-1, keepdims=True)
        return (t - mu) / jnp.sqrt(var + 1e-5) * g + b

    h1 = ln(hf + a, p["ln1_g"], p["ln1_b"])
    ff = jnp.maximum(h1 @ p["ff1_w"] + p["ff1_b"], 0.0) @ p["ff2_w"] + p["ff2_b"]
    h2 = ln(h1 + ff, p["ln2_g"], p["ln2_b"])

    z = h2.reshape(B, S * E)
    for name in ("l1", "l2", "l3", "l4", "l5"):
        z = jnp.maximum(z @ p[f"{name}_w"] + p[f"{name}_b"], 0.0)
    return z @ p["out_w"] + p["out_b"]


# ----------------------------------------------------------------------------
# Deterministic parameter construction
# ----------------------------------------------------------------------------
def init_params(key, seq_len, embed_size, nhead, dim_feedforward):
    E, S, dff = embed_size, seq_len, dim_feedforward

    def nrm(k, shape, scale=0.05):
        return scale * jax.random.normal(k, shape, dtype=jnp.float32)

    ks = iter(jax.random.split(key, 32))
    p = {
        "nhead": nhead,
        # input_embedding: Linear(1, E)   (weights stored pre-transposed (K, N))
        "emb_w": nrm(next(ks), (1, E)),
        "emb_b": nrm(next(ks), (1, E)),
        # MultiheadAttention
        "in_proj_w": nrm(next(ks), (E, 3 * E)),
        "in_proj_b": nrm(next(ks), (1, 3 * E)),
        "out_proj_w": nrm(next(ks), (E, E)),
        "out_proj_b": nrm(next(ks), (1, E)),
        # LayerNorms
        "ln1_g": jnp.ones((1, E), jnp.float32),
        "ln1_b": jnp.zeros((1, E), jnp.float32),
        "ln2_g": jnp.ones((1, E), jnp.float32),
        "ln2_b": jnp.zeros((1, E), jnp.float32),
        # encoder feed-forward
        "ff1_w": nrm(next(ks), (E, dff)),
        "ff1_b": nrm(next(ks), (1, dff)),
        "ff2_w": nrm(next(ks), (dff, E)),
        "ff2_b": nrm(next(ks), (1, E)),
        # MLP head
        "l1_w": nrm(next(ks), (S * E, dff)),
        "l1_b": nrm(next(ks), (1, dff)),
        "l2_w": nrm(next(ks), (dff, dff // 2)),
        "l2_b": nrm(next(ks), (1, dff // 2)),
        "l3_w": nrm(next(ks), (dff // 2, dff // 4)),
        "l3_b": nrm(next(ks), (1, dff // 4)),
        "l4_w": nrm(next(ks), (dff // 4, dff // 16)),
        "l4_b": nrm(next(ks), (1, dff // 16)),
        "l5_w": nrm(next(ks), (dff // 16, dff // 64)),
        "l5_b": nrm(next(ks), (1, dff // 64)),
        "out_w": nrm(next(ks), (dff // 64, 1)),
        "out_b": nrm(next(ks), (1, 1)),
    }

    # PositionalEncoding buffer pe: (max_len=seq_len, 1, E)
    position = jnp.arange(S, dtype=jnp.float32)[:, None]
    div_term = jnp.exp(
        jnp.arange(0, E, 2, dtype=jnp.float32) * (-math.log(10000.0) / E)
    )
    pe = jnp.zeros((S, 1, E), jnp.float32)
    pe = pe.at[:, 0, 0::2].set(jnp.sin(position * div_term))
    pe = pe.at[:, 0, 1::2].set(jnp.cos(position * div_term))
    p["pe"] = pe
    return p


# ----------------------------------------------------------------------------
if __name__ == "__main__":
    # Small shapes consistent with the module (seq_len*embed_size feeds linear1)
    B, SEQ_LEN, EMBED, NHEAD, DFF = 2, 16, 32, 4, 256

    key = jax.random.PRNGKey(0)
    pkey, xkey = jax.random.split(key)
    params = init_params(pkey, SEQ_LEN, EMBED, NHEAD, DFF)
    x = jax.random.normal(xkey, (B, SEQ_LEN, 1), dtype=jnp.float32)

    out = jax.block_until_ready(forecasting_forward(x, params))
    ref = jax.block_until_ready(reference_forward(x, params))

    assert out.shape == (B, 1), out.shape
    assert jnp.all(jnp.isfinite(out))
    # Slightly relaxed rtol: in-kernel softmax uses the EUP approximate
    # reciprocal (error << 1e-4 at the final output per error propagation).
    assert jnp.allclose(out, ref, rtol=1e-3, atol=1e-4), (out, ref)
    print("KERNEL_OK")
</pallas_src>

<mosaic_0001>
module attributes {stable_mosaic.version = 11 : i64} {
  func.func @fused_forward_kernel(%arg0: i32, %arg1: memref<1x16x1xf32, #tpu.memory_space<vmem>>, %arg2: memref<1x1x32xf32, #tpu.memory_space<vmem>>, %arg3: memref<1x32xf32, #tpu.memory_space<vmem>>, %arg4: memref<1x32xf32, #tpu.memory_space<vmem>>, %arg5: memref<32x32xf32, #tpu.memory_space<vmem>>, %arg6: memref<32x32xf32, #tpu.memory_space<vmem>>, %arg7: memref<32x32xf32, #tpu.memory_space<vmem>>, %arg8: memref<1x32xf32, #tpu.memory_space<vmem>>, %arg9: memref<1x32xf32, #tpu.memory_space<vmem>>, %arg10: memref<1x32xf32, #tpu.memory_space<vmem>>, %arg11: memref<32x32xf32, #tpu.memory_space<vmem>>, %arg12: memref<1x32xf32, #tpu.memory_space<vmem>>, %arg13: memref<1x32xf32, #tpu.memory_space<vmem>>, %arg14: memref<1x32xf32, #tpu.memory_space<vmem>>, %arg15: memref<32x256xf32, #tpu.memory_space<vmem>>, %arg16: memref<1x256xf32, #tpu.memory_space<vmem>>, %arg17: memref<256x32xf32, #tpu.memory_space<vmem>>, %arg18: memref<1x32xf32, #tpu.memory_space<vmem>>, %arg19: memref<1x32xf32, #tpu.memory_space<vmem>>, %arg20: memref<1x32xf32, #tpu.memory_space<vmem>>, %arg21: memref<512x256xf32, #tpu.memory_space<vmem>>, %arg22: memref<1x256xf32, #tpu.memory_space<vmem>>, %arg23: memref<256x128xf32, #tpu.memory_space<vmem>>, %arg24: memref<1x128xf32, #tpu.memory_space<vmem>>, %arg25: memref<128x64xf32, #tpu.memory_space<vmem>>, %arg26: memref<1x64xf32, #tpu.memory_space<vmem>>, %arg27: memref<64x16xf32, #tpu.memory_space<vmem>>, %arg28: memref<1x16xf32, #tpu.memory_space<vmem>>, %arg29: memref<16x4xf32, #tpu.memory_space<vmem>>, %arg30: memref<1x4xf32, #tpu.memory_space<vmem>>, %arg31: memref<1x4xf32, #tpu.memory_space<vmem>>, %arg32: memref<1x1xf32, #tpu.memory_space<vmem>>, %arg33: memref<1x1x1xf32, #tpu.memory_space<vmem>>) attributes {dimension_semantics = [#tpu.dimension_semantics<parallel>], iteration_bounds = array<i64: 2>, scalar_prefetch = 0 : i64, scratch_operands = 0 : i64, tpu.core_type = #tpu.core_type<tc>, window_params = [{transform_indices = @transform_0, window_bounds = array<i64: 1, 16, 1>}, {transform_indices = @transform_1, window_bounds = array<i64: 1, 1, 32>}, {pipeline_mode = #tpu.pipeline_mode<synchronous>, transform_indices = @transform_2, window_bounds = array<i64: 1, 32>}, {pipeline_mode = #tpu.pipeline_mode<synchronous>, transform_indices = @transform_3, window_bounds = array<i64: 1, 32>}, {pipeline_mode = #tpu.pipeline_mode<synchronous>, transform_indices = @transform_4, window_bounds = array<i64: 32, 32>}, {pipeline_mode = #tpu.pipeline_mode<synchronous>, transform_indices = @transform_5, window_bounds = array<i64: 32, 32>}, {pipeline_mode = #tpu.pipeline_mode<synchronous>, transform_indices = @transform_6, window_bounds = array<i64: 32, 32>}, {pipeline_mode = #tpu.pipeline_mode<synchronous>, transform_indices = @transform_7, window_bounds = array<i64: 1, 32>}, {pipeline_mode = #tpu.pipeline_mode<synchronous>, transform_indices = @transform_8, window_bounds = array<i64: 1, 32>}, {pipeline_mode = #tpu.pipeline_mode<synchronous>, transform_indices = @transform_9, window_bounds = array<i64: 1, 32>}, {pipeline_mode = #tpu.pipeline_mode<synchronous>, transform_indices = @transform_10, window_bounds = array<i64: 32, 32>}, {pipeline_mode = #tpu.pipeline_mode<synchronous>, transform_indices = @transform_11, window_bounds = array<i64: 1, 32>}, {pipeline_mode = #tpu.pipeline_mode<synchronous>, transform_indices = @transform_12, window_bounds = array<i64: 1, 32>}, {pipeline_mode = #tpu.pipeline_mode<synchronous>, transform_indices = @transform_13, window_bounds = array<i64: 1, 32>}, {pipeline_mode = #tpu.pipeline_mode<synchronous>, transform_indices = @transform_14, window_bounds = array<i64: 32, 256>}, {pipeline_mode = #tpu.pipeline_mode<synchronous>, transform_indices = @transform_15, window_bounds = array<i64: 1, 256>}, {pipeline_mode = #tpu.pipeline_mode<synchronous>, transform_indices = @transform_16, window_bounds = array<i64: 256, 32>}, {pipeline_mode = #tpu.pipeline_mode<synchronous>, transform_indices = @transform_17, window_bounds = array<i64: 1, 32>}, {pipeline_mode = #tpu.pipeline_mode<synchronous>, transform_indices = @transform_18, window_bounds = array<i64: 1, 32>}, {pipeline_mode = #tpu.pipeline_mode<synchronous>, transform_indices = @transform_19, window_bounds = array<i64: 1, 32>}, {pipeline_mode = #tpu.pipeline_mode<synchronous>, transform_indices = @transform_20, window_bounds = array<i64: 512, 256>}, {pipeline_mode = #tpu.pipeline_mode<synchronous>, transform_indices = @transform_21, window_bounds = array<i64: 1, 256>}, {pipeline_mode = #tpu.pipeline_mode<synchronous>, transform_indices = @transform_22, window_bounds = array<i64: 256, 128>}, {pipeline_mode = #tpu.pipeline_mode<synchronous>, transform_indices = @transform_23, window_bounds = array<i64: 1, 128>}, {pipeline_mode = #tpu.pipeline_mode<synchronous>, transform_indices = @transform_24, window_bounds = array<i64: 128, 64>}, {pipeline_mode = #tpu.pipeline_mode<synchronous>, transform_indices = @transform_25, window_bounds = array<i64: 1, 64>}, {pipeline_mode = #tpu.pipeline_mode<synchronous>, transform_indices = @transform_26, window_bounds = array<i64: 64, 16>}, {pipeline_mode = #tpu.pipeline_mode<synchronous>, transform_indices = @transform_27, window_bounds = array<i64: 1, 16>}, {pipeline_mode = #tpu.pipeline_mode<synchronous>, transform_indices = @transform_28, window_bounds = array<i64: 16, 4>}, {pipeline_mode = #tpu.pipeline_mode<synchronous>, transform_indices = @transform_29, window_bounds = array<i64: 1, 4>}, {pipeline_mode = #tpu.pipeline_mode<synchronous>, transform_indices = @transform_30, window_bounds = array<i64: 1, 4>}, {pipeline_mode = #tpu.pipeline_mode<synchronous>, transform_indices = @transform_31, window_bounds = array<i64: 1, 1>}, {transform_indices = @transform_32, window_bounds = array<i64: 1, 1, 1>}]} {
    %c0 = arith.constant 0 : index
    %c0_0 = arith.constant 0 : index
    %c0_1 = arith.constant 0 : index
    %0 = vector.load %arg1[%c0, %c0_0, %c0_1] : memref<1x16x1xf32, #tpu.memory_space<vmem>>, vector<1x16x1xf32>
    %1 = vector.shape_cast %0 : vector<1x16x1xf32> to vector<16x1xf32>
    %c0_2 = arith.constant 0 : index
    %c0_3 = arith.constant 0 : index
    %2 = vector.load %arg3[%c0_2, %c0_3] : memref<1x32xf32, #tpu.memory_space<vmem>>, vector<1x32xf32>
    %3 = vector.broadcast %1 : vector<16x1xf32> to vector<16x32xf32>
    %4 = vector.broadcast %2 : vector<1x32xf32> to vector<16x32xf32>
    %5 = arith.mulf %3, %4 : vector<16x32xf32>
    %c0_4 = arith.constant 0 : index
    %c0_5 = arith.constant 0 : index
    %6 = vector.load %arg4[%c0_4, %c0_5] : memref<1x32xf32, #tpu.memory_space<vmem>>, vector<1x32xf32>
    %7 = vector.broadcast %6 : vector<1x32xf32> to vector<16x32xf32>
    %8 = arith.addf %5, %7 : vector<16x32xf32>
    %c0_6 = arith.constant 0 : index
    %c0_7 = arith.constant 0 : index
    %c0_8 = arith.constant 0 : index
    %9 = vector.load %arg2[%c0_6, %c0_7, %c0_8] : memref<1x1x32xf32, #tpu.memory_space<vmem>>, vector<1x1x32xf32>
    %10 = vector.shape_cast %9 : vector<1x1x32xf32> to vector<1x32xf32>
    %11 = vector.broadcast %10 : vector<1x32xf32> to vector<16x32xf32>
    %12 = arith.addf %8, %11 : vector<16x32xf32>
    %c0_9 = arith.constant 0 : index
    %c0_10 = arith.constant 0 : index
    %13 = vector.load %arg5[%c0_9, %c0_10] : memref<32x32xf32, #tpu.memory_space<vmem>>, vector<32x32xf32>
    %cst = arith.constant dense<0.000000e+00> : vector<16x32xf32>
    %14 = tpu.matmul %12, %13, %cst {dimension_numbers = #tpu.dot_dimension_numbers<[1], [0], [0], [1], [0, 0, 1, 1], [], []>} : vector<16x32xf32>, vector<32x32xf32>, vector<16x32xf32> -> vector<16x32xf32>
    %c0_11 = arith.constant 0 : index
    %c0_12 = arith.constant 0 : index
    %15 = vector.load %arg8[%c0_11, %c0_12] : memref<1x32xf32, #tpu.memory_space<vmem>>, vector<1x32xf32>
    %16 = vector.broadcast %15 : vector<1x32xf32> to vector<16x32xf32>
    %17 = arith.addf %14, %16 : vector<16x32xf32>
    %c0_13 = arith.constant 0 : index
    %c0_14 = arith.constant 0 : index
    %18 = vector.load %arg6[%c0_13, %c0_14] : memref<32x32xf32, #tpu.memory_space<vmem>>, vector<32x32xf32>
    %cst_15 = arith.constant dense<0.000000e+00> : vector<16x32xf32>
    %19 = tpu.matmul %12, %18, %cst_15 {dimension_numbers = #tpu.dot_dimension_numbers<[1], [0], [0], [1], [0, 0, 1, 1], [], []>} : vector<16x32xf32>, vector<32x32xf32>, vector<16x32xf32> -> vector<16x32xf32>
    %c0_16 = arith.constant 0 : index
    %c0_17 = arith.constant 0 : index
    %20 = vector.load %arg9[%c0_16, %c0_17] : memref<1x32xf32, #tpu.memory_space<vmem>>, vector<1x32xf32>
    %21 = vector.broadcast %20 : vector<1x32xf32> to vector<16x32xf32>
    %22 = arith.addf %19, %21 : vector<16x32xf32>
    %c0_18 = arith.constant 0 : index
    %c0_19 = arith.constant 0 : index
    %23 = vector.load %arg7[%c0_18, %c0_19] : memref<32x32xf32, #tpu.memory_space<vmem>>, vector<32x32xf32>
    %cst_20 = arith.constant dense<0.000000e+00> : vector<16x32xf32>
    %24 = tpu.matmul %12, %23, %cst_20 {dimension_numbers = #tpu.dot_dimension_numbers<[1], [0], [0], [1], [0, 0, 1, 1], [], []>} : vector<16x32xf32>, vector<32x32xf32>, vector<16x32xf32> -> vector<16x32xf32>
    %c0_21 = arith.constant 0 : index
    %c0_22 = arith.constant 0 : index
    %25 = vector.load %arg10[%c0_21, %c0_22] : memref<1x32xf32, #tpu.memory_space<vmem>>, vector<1x32xf32>
    %26 = vector.broadcast %25 : vector<1x32xf32> to vector<16x32xf32>
    %27 = arith.addf %24, %26 : vector<16x32xf32>
    %28 = tpu.iota {dimensions = array<i32: 0>} : vector<16x16xi32>
    %29 = tpu.iota {dimensions = array<i32: 1>} : vector<16x16xi32>
    %30 = arith.cmpi sgt, %29, %28 : vector<16x16xi32>
    %cst_23 = arith.constant -1.000000e+30 : f32
    %cst_24 = arith.constant 0.000000e+00 : f32
    %31 = vector.broadcast %cst_23 : f32 to vector<16x16xf32>
    %32 = vector.broadcast %cst_24 : f32 to vector<16x16xf32>
    %33 = arith.select %30, %31, %32 : vector<16x16xi1>, vector<16x16xf32>
    %34 = vector.extract_strided_slice %17 {offsets = [0, 0], sizes = [16, 8], strides = [1, 1]} : vector<16x32xf32> to vector<16x8xf32>
    %35 = vector.extract_strided_slice %22 {offsets = [0, 0], sizes = [16, 8], strides = [1, 1]} : vector<16x32xf32> to vector<16x8xf32>
    %36 = vector.extract_strided_slice %27 {offsets = [0, 0], sizes = [16, 8], strides = [1, 1]} : vector<16x32xf32> to vector<16x8xf32>
    %cst_25 = arith.constant dense<0.000000e+00> : vector<16x16xf32>
    %37 = tpu.matmul %34, %35, %cst_25 {dimension_numbers = #tpu.dot_dimension_numbers<[1], [1], [0], [0], [0, 0, 1, 0], [], []>} : vector<16x8xf32>, vector<16x8xf32>, vector<16x16xf32> -> vector<16x16xf32>
    %cst_26 = arith.constant 0.353553385 : f32
    %38 = vector.broadcast %cst_26 : f32 to vector<16x16xf32>
    %39 = arith.mulf %37, %38 : vector<16x16xf32>
    %40 = arith.addf %39, %33 : vector<16x16xf32>
    %cst_27 = arith.constant dense<0xFF800000> : vector<16xf32>
    %41 = vector.multi_reduction <maximumf>, %40, %cst_27 [1] : vector<16x16xf32> to vector<16xf32>
    %42 = vector.shape_cast %41 : vector<16xf32> to vector<16x1xf32>
    %43 = vector.broadcast %42 : vector<16x1xf32> to vector<16x16xf32>
    %44 = arith.subf %40, %43 : vector<16x16xf32>
    %45 = math.exp %44 : vector<16x16xf32>
    %cst_28 = arith.constant dense<0.000000e+00> : vector<16xf32>
    %46 = vector.multi_reduction <add>, %45, %cst_28 [1] : vector<16x16xf32> to vector<16xf32>
    %47 = vector.shape_cast %46 : vector<16xf32> to vector<16x1xf32>
    %48 = tpu.reciprocal %47 {approx = true} : vector<16x1xf32> -> vector<16x1xf32>
    %49 = vector.broadcast %48 : vector<16x1xf32> to vector<16x16xf32>
    %50 = arith.mulf %45, %49 : vector<16x16xf32>
    %cst_29 = arith.constant dense<0.000000e+00> : vector<16x8xf32>
    %51 = tpu.matmul %50, %36, %cst_29 {dimension_numbers = #tpu.dot_dimension_numbers<[1], [0], [0], [1], [0, 0, 1, 1], [], []>} : vector<16x16xf32>, vector<16x8xf32>, vector<16x8xf32> -> vector<16x8xf32>
    %52 = vector.extract_strided_slice %17 {offsets = [0, 8], sizes = [16, 8], strides = [1, 1]} : vector<16x32xf32> to vector<16x8xf32>
    %53 = vector.extract_strided_slice %22 {offsets = [0, 8], sizes = [16, 8], strides = [1, 1]} : vector<16x32xf32> to vector<16x8xf32>
    %54 = vector.extract_strided_slice %27 {offsets = [0, 8], sizes = [16, 8], strides = [1, 1]} : vector<16x32xf32> to vector<16x8xf32>
    %cst_30 = arith.constant dense<0.000000e+00> : vector<16x16xf32>
    %55 = tpu.matmul %52, %53, %cst_30 {dimension_numbers = #tpu.dot_dimension_numbers<[1], [1], [0], [0], [0, 0, 1, 0], [], []>} : vector<16x8xf32>, vector<16x8xf32>, vector<16x16xf32> -> vector<16x16xf32>
    %cst_31 = arith.constant 0.353553385 : f32
    %56 = vector.broadcast %cst_31 : f32 to vector<16x16xf32>
    %57 = arith.mulf %55, %56 : vector<16x16xf32>
    %58 = arith.addf %57, %33 : vector<16x16xf32>
    %cst_32 = arith.constant dense<0xFF800000> : vector<16xf32>
    %59 = vector.multi_reduction <maximumf>, %58, %cst_32 [1] : vector<16x16xf32> to vector<16xf32>
    %60 = vector.shape_cast %59 : vector<16xf32> to vector<16x1xf32>
    %61 = vector.broadcast %60 : vector<16x1xf32> to vector<16x16xf32>
    %62 = arith.subf %58, %61 : vector<16x16xf32>
    %63 = math.exp %62 : vector<16x16xf32>
    %cst_33 = arith.constant dense<0.000000e+00> : vector<16xf32>
    %64 = vector.multi_reduction <add>, %63, %cst_33 [1] : vector<16x16xf32> to vector<16xf32>
    %65 = vector.shape_cast %64 : vector<16xf32> to vector<16x1xf32>
    %66 = tpu.reciprocal %65 {approx = true} : vector<16x1xf32> -> vector<16x1xf32>
    %67 = vector.broadcast %66 : vector<16x1xf32> to vector<16x16xf32>
    %68 = arith.mulf %63, %67 : vector<16x16xf32>
    %cst_34 = arith.constant dense<0.000000e+00> : vector<16x8xf32>
    %69 = tpu.matmul %68, %54, %cst_34 {dimension_numbers = #tpu.dot_dimension_numbers<[1], [0], [0], [1], [0, 0, 1, 1], [], []>} : vector<16x16xf32>, vector<16x8xf32>, vector<16x8xf32> -> vector<16x8xf32>
    %70 = vector.extract_strided_slice %17 {offsets = [0, 16], sizes = [16, 8], strides = [1, 1]} : vector<16x32xf32> to vector<16x8xf32>
    %71 = vector.extract_strided_slice %22 {offsets = [0, 16], sizes = [16, 8], strides = [1, 1]} : vector<16x32xf32> to vector<16x8xf32>
    %72 = vector.extract_strided_slice %27 {offsets = [0, 16], sizes = [16, 8], strides = [1, 1]} : vector<16x32xf32> to vector<16x8xf32>
    %cst_35 = arith.constant dense<0.000000e+00> : vector<16x16xf32>
    %73 = tpu.matmul %70, %71, %cst_35 {dimension_numbers = #tpu.dot_dimension_numbers<[1], [1], [0], [0], [0, 0, 1, 0], [], []>} : vector<16x8xf32>, vector<16x8xf32>, vector<16x16xf32> -> vector<16x16xf32>
    %cst_36 = arith.constant 0.353553385 : f32
    %74 = vector.broadcast %cst_36 : f32 to vector<16x16xf32>
    %75 = arith.mulf %73, %74 : vector<16x16xf32>
    %76 = arith.addf %75, %33 : vector<16x16xf32>
    %cst_37 = arith.constant dense<0xFF800000> : vector<16xf32>
    %77 = vector.multi_reduction <maximumf>, %76, %cst_37 [1] : vector<16x16xf32> to vector<16xf32>
    %78 = vector.shape_cast %77 : vector<16xf32> to vector<16x1xf32>
    %79 = vector.broadcast %78 : vector<16x1xf32> to vector<16x16xf32>
    %80 = arith.subf %76, %79 : vector<16x16xf32>
    %81 = math.exp %80 : vector<16x16xf32>
    %cst_38 = arith.constant dense<0.000000e+00> : vector<16xf32>
    %82 = vector.multi_reduction <add>, %81, %cst_38 [1] : vector<16x16xf32> to vector<16xf32>
    %83 = vector.shape_cast %82 : vector<16xf32> to vector<16x1xf32>
    %84 = tpu.reciprocal %83 {approx = true} : vector<16x1xf32> -> vector<16x1xf32>
    %85 = vector.broadcast %84 : vector<16x1xf32> to vector<16x16xf32>
    %86 = arith.mulf %81, %85 : vector<16x16xf32>
    %cst_39 = arith.constant dense<0.000000e+00> : vector<16x8xf32>
    %87 = tpu.matmul %86, %72, %cst_39 {dimension_numbers = #tpu.dot_dimension_numbers<[1], [0], [0], [1], [0, 0, 1, 1], [], []>} : vector<16x16xf32>, vector<16x8xf32>, vector<16x8xf32> -> vector<16x8xf32>
    %88 = vector.extract_strided_slice %17 {offsets = [0, 24], sizes = [16, 8], strides = [1, 1]} : vector<16x32xf32> to vector<16x8xf32>
    %89 = vector.extract_strided_slice %22 {offsets = [0, 24], sizes = [16, 8], strides = [1, 1]} : vector<16x32xf32> to vector<16x8xf32>
    %90 = vector.extract_strided_slice %27 {offsets = [0, 24], sizes = [16, 8], strides = [1, 1]} : vector<16x32xf32> to vector<16x8xf32>
    %cst_40 = arith.constant dense<0.000000e+00> : vector<16x16xf32>
    %91 = tpu.matmul %88, %89, %cst_40 {dimension_numbers = #tpu.dot_dimension_numbers<[1], [1], [0], [0], [0, 0, 1, 0], [], []>} : vector<16x8xf32>, vector<16x8xf32>, vector<16x16xf32> -> vector<16x16xf32>
    %cst_41 = arith.constant 0.353553385 : f32
    %92 = vector.broadcast %cst_41 : f32 to vector<16x16xf32>
    %93 = arith.mulf %91, %92 : vector<16x16xf32>
    %94 = arith.addf %93, %33 : vector<16x16xf32>
    %cst_42 = arith.constant dense<0xFF800000> : vector<16xf32>
    %95 = vector.multi_reduction <maximumf>, %94, %cst_42 [1] : vector<16x16xf32> to vector<16xf32>
    %96 = vector.shape_cast %95 : vector<16xf32> to vector<16x1xf32>
    %97 = vector.broadcast %96 : vector<16x1xf32> to vector<16x16xf32>
    %98 = arith.subf %94, %97 : vector<16x16xf32>
    %99 = math.exp %98 : vector<16x16xf32>
    %cst_43 = arith.constant dense<0.000000e+00> : vector<16xf32>
    %100 = vector.multi_reduction <add>, %99, %cst_43 [1] : vector<16x16xf32> to vector<16xf32>
    %101 = vector.shape_cast %100 : vector<16xf32> to vector<16x1xf32>
    %102 = tpu.reciprocal %101 {approx = true} : vector<16x1xf32> -> vector<16x1xf32>
    %103 = vector.broadcast %102 : vector<16x1xf32> to vector<16x16xf32>
    %104 = arith.mulf %99, %103 : vector<16x16xf32>
    %cst_44 = arith.constant dense<0.000000e+00> : vector<16x8xf32>
    %105 = tpu.matmul %104, %90, %cst_44 {dimension_numbers = #tpu.dot_dimension_numbers<[1], [0], [0], [1], [0, 0, 1, 1], [], []>} : vector<16x16xf32>, vector<16x8xf32>, vector<16x8xf32> -> vector<16x8xf32>
    %106 = tpu.concatenate %51, %69, %87, %105 in 1 : vector<16x8xf32>, vector<16x8xf32>, vector<16x8xf32>, vector<16x8xf32> -> vector<16x32xf32>
    %c0_45 = arith.constant 0 : index
    %c0_46 = arith.constant 0 : index
    %107 = vector.load %arg11[%c0_45, %c0_46] : memref<32x32xf32, #tpu.memory_space<vmem>>, vector<32x32xf32>
    %cst_47 = arith.constant dense<0.000000e+00> : vector<16x32xf32>
    %108 = tpu.matmul %106, %107, %cst_47 {dimension_numbers = #tpu.dot_dimension_numbers<[1], [0], [0], [1], [0, 0, 1, 1], [], []>} : vector<16x32xf32>, vector<32x32xf32>, vector<16x32xf32> -> vector<16x32xf32>
    %c0_48 = arith.constant 0 : index
    %c0_49 = arith.constant 0 : index
    %109 = vector.load %arg12[%c0_48, %c0_49] : memref<1x32xf32, #tpu.memory_space<vmem>>, vector<1x32xf32>
    %110 = vector.broadcast %109 : vector<1x32xf32> to vector<16x32xf32>
    %111 = arith.addf %108, %110 : vector<16x32xf32>
    %112 = arith.addf %12, %111 : vector<16x32xf32>
    %c0_50 = arith.constant 0 : index
    %c0_51 = arith.constant 0 : index
    %113 = vector.load %arg13[%c0_50, %c0_51] : memref<1x32xf32, #tpu.memory_space<vmem>>, vector<1x32xf32>
    %c0_52 = arith.constant 0 : index
    %c0_53 = arith.constant 0 : index
    %114 = vector.load %arg14[%c0_52, %c0_53] : memref<1x32xf32, #tpu.memory_space<vmem>>, vector<1x32xf32>
    %cst_54 = arith.constant dense<0.000000e+00> : vector<16xf32>
    %115 = vector.multi_reduction <add>, %112, %cst_54 [1] : vector<16x32xf32> to vector<16xf32>
    %116 = vector.shape_cast %115 : vector<16xf32> to vector<16x1xf32>
    %cst_55 = arith.constant 3.200000e+01 : f32
    %117 = vector.broadcast %cst_55 : f32 to vector<16x1xf32>
    %118 = arith.divf %116, %117 : vector<16x1xf32>
    %119 = vector.broadcast %118 : vector<16x1xf32> to vector<16x32xf32>
    %120 = arith.subf %112, %119 : vector<16x32xf32>
    %121 = arith.mulf %120, %120 : vector<16x32xf32>
    %cst_56 = arith.constant dense<0.000000e+00> : vector<16xf32>
    %122 = vector.multi_reduction <add>, %121, %cst_56 [1] : vector<16x32xf32> to vector<16xf32>
    %123 = vector.shape_cast %122 : vector<16xf32> to vector<16x1xf32>
    %cst_57 = arith.constant 3.200000e+01 : f32
    %124 = vector.broadcast %cst_57 : f32 to vector<16x1xf32>
    %125 = arith.divf %123, %124 : vector<16x1xf32>
    %cst_58 = arith.constant 9.99999974E-6 : f32
    %126 = vector.broadcast %cst_58 : f32 to vector<16x1xf32>
    %127 = arith.addf %125, %126 : vector<16x1xf32>
    %128 = math.rsqrt %127 : vector<16x1xf32>
    %129 = vector.broadcast %128 : vector<16x1xf32> to vector<16x32xf32>
    %130 = arith.mulf %120, %129 : vector<16x32xf32>
    %131 = vector.broadcast %113 : vector<1x32xf32> to vector<16x32xf32>
    %132 = arith.mulf %130, %131 : vector<16x32xf32>
    %133 = vector.broadcast %114 : vector<1x32xf32> to vector<16x32xf32>
    %134 = arith.addf %132, %133 : vector<16x32xf32>
    %c0_59 = arith.constant 0 : index
    %c0_60 = arith.constant 0 : index
    %135 = vector.load %arg15[%c0_59, %c0_60] : memref<32x256xf32, #tpu.memory_space<vmem>>, vector<32x256xf32>
    %cst_61 = arith.constant dense<0.000000e+00> : vector<16x256xf32>
    %136 = tpu.matmul %134, %135, %cst_61 {dimension_numbers = #tpu.dot_dimension_numbers<[1], [0], [0], [1], [0, 0, 1, 1], [], []>} : vector<16x32xf32>, vector<32x256xf32>, vector<16x256xf32> -> vector<16x256xf32>
    %c0_62 = arith.constant 0 : index
    %c0_63 = arith.constant 0 : index
    %137 = vector.load %arg16[%c0_62, %c0_63] : memref<1x256xf32, #tpu.memory_space<vmem>>, vector<1x256xf32>
    %138 = vector.broadcast %137 : vector<1x256xf32> to vector<16x256xf32>
    %139 = arith.addf %136, %138 : vector<16x256xf32>
    %cst_64 = arith.constant 0.000000e+00 : f32
    %140 = vector.broadcast %cst_64 : f32 to vector<16x256xf32>
    %141 = arith.maximumf %139, %140 : vector<16x256xf32>
    %c0_65 = arith.constant 0 : index
    %c0_66 = arith.constant 0 : index
    %142 = vector.load %arg17[%c0_65, %c0_66] : memref<256x32xf32, #tpu.memory_space<vmem>>, vector<256x32xf32>
    %cst_67 = arith.constant dense<0.000000e+00> : vector<16x32xf32>
    %143 = tpu.matmul %141, %142, %cst_67 {dimension_numbers = #tpu.dot_dimension_numbers<[1], [0], [0], [1], [0, 0, 1, 1], [], []>} : vector<16x256xf32>, vector<256x32xf32>, vector<16x32xf32> -> vector<16x32xf32>
    %c0_68 = arith.constant 0 : index
    %c0_69 = arith.constant 0 : index
    %144 = vector.load %arg18[%c0_68, %c0_69] : memref<1x32xf32, #tpu.memory_space<vmem>>, vector<1x32xf32>
    %145 = vector.broadcast %144 : vector<1x32xf32> to vector<16x32xf32>
    %146 = arith.addf %143, %145 : vector<16x32xf32>
    %147 = arith.addf %134, %146 : vector<16x32xf32>
    %c0_70 = arith.constant 0 : index
    %c0_71 = arith.constant 0 : index
    %148 = vector.load %arg19[%c0_70, %c0_71] : memref<1x32xf32, #tpu.memory_space<vmem>>, vector<1x32xf32>
    %c0_72 = arith.constant 0 : index
    %c0_73 = arith.constant 0 : index
    %149 = vector.load %arg20[%c0_72, %c0_73] : memref<1x32xf32, #tpu.memory_space<vmem>>, vector<1x32xf32>
    %cst_74 = arith.constant dense<0.000000e+00> : vector<16xf32>
    %150 = vector.multi_reduction <add>, %147, %cst_74 [1] : vector<16x32xf32> to vector<16xf32>
    %151 = vector.shape_cast %150 : vector<16xf32> to vector<16x1xf32>
    %cst_75 = arith.constant 3.200000e+01 : f32
    %152 = vector.broadcast %cst_75 : f32 to vector<16x1xf32>
    %153 = arith.divf %151, %152 : vector<16x1xf32>
    %154 = vector.broadcast %153 : vector<16x1xf32> to vector<16x32xf32>
    %155 = arith.subf %147, %154 : vector<16x32xf32>
    %156 = arith.mulf %155, %155 : vector<16x32xf32>
    %cst_76 = arith.constant dense<0.000000e+00> : vector<16xf32>
    %157 = vector.multi_reduction <add>, %156, %cst_76 [1] : vector<16x32xf32> to vector<16xf32>
    %158 = vector.shape_cast %157 : vector<16xf32> to vector<16x1xf32>
    %cst_77 = arith.constant 3.200000e+01 : f32
    %159 = vector.broadcast %cst_77 : f32 to vector<16x1xf32>
    %160 = arith.divf %158, %159 : vector<16x1xf32>
    %cst_78 = arith.constant 9.99999974E-6 : f32
    %161 = vector.broadcast %cst_78 : f32 to vector<16x1xf32>
    %162 = arith.addf %160, %161 : vector<16x1xf32>
    %163 = math.rsqrt %162 : vector<16x1xf32>
    %164 = vector.broadcast %163 : vector<16x1xf32> to vector<16x32xf32>
    %165 = arith.mulf %155, %164 : vector<16x32xf32>
    %166 = vector.broadcast %148 : vector<1x32xf32> to vector<16x32xf32>
    %167 = arith.mulf %165, %166 : vector<16x32xf32>
    %168 = vector.broadcast %149 : vector<1x32xf32> to vector<16x32xf32>
    %169 = arith.addf %167, %168 : vector<16x32xf32>
    %c0_79 = arith.constant 0 : index
    %c0_80 = arith.constant 0 : index
    %170 = vector.load %arg22[%c0_79, %c0_80] : memref<1x256xf32, #tpu.memory_space<vmem>>, vector<1x256xf32>
    %171 = vector.extract_strided_slice %169 {offsets = [0, 0], sizes = [1, 32], strides = [1, 1]} : vector<16x32xf32> to vector<1x32xf32>
    %c0_81 = arith.constant 0 : index
    %c0_82 = arith.constant 0 : index
    %172 = vector.load %arg21[%c0_81, %c0_82] : memref<512x256xf32, #tpu.memory_space<vmem>>, vector<32x256xf32>
    %cst_83 = arith.constant dense<0.000000e+00> : vector<1x256xf32>
    %173 = tpu.matmul %171, %172, %cst_83 {dimension_numbers = #tpu.dot_dimension_numbers<[1], [0], [0], [1], [0, 0, 1, 1], [], []>} : vector<1x32xf32>, vector<32x256xf32>, vector<1x256xf32> -> vector<1x256xf32>
    %174 = arith.addf %170, %173 : vector<1x256xf32>
    %175 = vector.extract_strided_slice %169 {offsets = [1, 0], sizes = [1, 32], strides = [1, 1]} : vector<16x32xf32> to vector<1x32xf32>
    %c32 = arith.constant 32 : index
    %c0_84 = arith.constant 0 : index
    %176 = vector.load %arg21[%c32, %c0_84] : memref<512x256xf32, #tpu.memory_space<vmem>>, vector<32x256xf32>
    %cst_85 = arith.constant dense<0.000000e+00> : vector<1x256xf32>
    %177 = tpu.matmul %175, %176, %cst_85 {dimension_numbers = #tpu.dot_dimension_numbers<[1], [0], [0], [1], [0, 0, 1, 1], [], []>} : vector<1x32xf32>, vector<32x256xf32>, vector<1x256xf32> -> vector<1x256xf32>
    %178 = arith.addf %174, %177 : vector<1x256xf32>
    %179 = vector.extract_strided_slice %169 {offsets = [2, 0], sizes = [1, 32], strides = [1, 1]} : vector<16x32xf32> to vector<1x32xf32>
    %c64 = arith.constant 64 : index
    %c0_86 = arith.constant 0 : index
    %180 = vector.load %arg21[%c64, %c0_86] : memref<512x256xf32, #tpu.memory_space<vmem>>, vector<32x256xf32>
    %cst_87 = arith.constant dense<0.000000e+00> : vector<1x256xf32>
    %181 = tpu.matmul %179, %180, %cst_87 {dimension_numbers = #tpu.dot_dimension_numbers<[1], [0], [0], [1], [0, 0, 1, 1], [], []>} : vector<1x32xf32>, vector<32x256xf32>, vector<1x256xf32> -> vector<1x256xf32>
    %182 = arith.addf %178, %181 : vector<1x256xf32>
    %183 = vector.extract_strided_slice %169 {offsets = [3, 0], sizes = [1, 32], strides = [1, 1]} : vector<16x32xf32> to vector<1x32xf32>
    %c96 = arith.constant 96 : index
    %c0_88 = arith.constant 0 : index
    %184 = vector.load %arg21[%c96, %c0_88] : memref<512x256xf32, #tpu.memory_space<vmem>>, vector<32x256xf32>
    %cst_89 = arith.constant dense<0.000000e+00> : vector<1x256xf32>
    %185 = tpu.matmul %183, %184, %cst_89 {dimension_numbers = #tpu.dot_dimension_numbers<[1], [0], [0], [1], [0, 0, 1, 1], [], []>} : vector<1x32xf32>, vector<32x256xf32>, vector<1x256xf32> -> vector<1x256xf32>
    %186 = arith.addf %182, %185 : vector<1x256xf32>
    %187 = vector.extract_strided_slice %169 {offsets = [4, 0], sizes = [1, 32], strides = [1, 1]} : vector<16x32xf32> to vector<1x32xf32>
    %c128 = arith.constant 128 : index
    %c0_90 = arith.constant 0 : index
    %188 = vector.load %arg21[%c128, %c0_90] : memref<512x256xf32, #tpu.memory_space<vmem>>, vector<32x256xf32>
    %cst_91 = arith.constant dense<0.000000e+00> : vector<1x256xf32>
    %189 = tpu.matmul %187, %188, %cst_91 {dimension_numbers = #tpu.dot_dimension_numbers<[1], [0], [0], [1], [0, 0, 1, 1], [], []>} : vector<1x32xf32>, vector<32x256xf32>, vector<1x256xf32> -> vector<1x256xf32>
    %190 = arith.addf %186, %189 : vector<1x256xf32>
    %191 = vector.extract_strided_slice %169 {offsets = [5, 0], sizes = [1, 32], strides = [1, 1]} : vector<16x32xf32> to vector<1x32xf32>
    %c160 = arith.constant 160 : index
    %c0_92 = arith.constant 0 : index
    %192 = vector.load %arg21[%c160, %c0_92] : memref<512x256xf32, #tpu.memory_space<vmem>>, vector<32x256xf32>
    %cst_93 = arith.constant dense<0.000000e+00> : vector<1x256xf32>
    %193 = tpu.matmul %191, %192, %cst_93 {dimension_numbers = #tpu.dot_dimension_numbers<[1], [0], [0], [1], [0, 0, 1, 1], [], []>} : vector<1x32xf32>, vector<32x256xf32>, vector<1x256xf32> -> vector<1x256xf32>
    %194 = arith.addf %190, %193 : vector<1x256xf32>
    %195 = vector.extract_strided_slice %169 {offsets = [6, 0], sizes = [1, 32], strides = [1, 1]} : vector<16x32xf32> to vector<1x32xf32>
    %c192 = arith.constant 192 : index
    %c0_94 = arith.constant 0 : index
    %196 = vector.load %arg21[%c192, %c0_94] : memref<512x256xf32, #tpu.memory_space<vmem>>, vector<32x256xf32>
    %cst_95 = arith.constant dense<0.000000e+00> : vector<1x256xf32>
    %197 = tpu.matmul %195, %196, %cst_95 {dimension_numbers = #tpu.dot_dimension_numbers<[1], [0], [0], [1], [0, 0, 1, 1], [], []>} : vector<1x32xf32>, vector<32x256xf32>, vector<1x256xf32> -> vector<1x256xf32>
    %198 = arith.addf %194, %197 : vector<1x256xf32>
    %199 = vector.extract_strided_slice %169 {offsets = [7, 0], sizes = [1, 32], strides = [1, 1]} : vector<16x32xf32> to vector<1x32xf32>
    %c224 = arith.constant 224 : index
    %c0_96 = arith.constant 0 : index
    %200 = vector.load %arg21[%c224, %c0_96] : memref<512x256xf32, #tpu.memory_space<vmem>>, vector<32x256xf32>
    %cst_97 = arith.constant dense<0.000000e+00> : vector<1x256xf32>
    %201 = tpu.matmul %199, %200, %cst_97 {dimension_numbers = #tpu.dot_dimension_numbers<[1], [0], [0], [1], [0, 0, 1, 1], [], []>} : vector<1x32xf32>, vector<32x256xf32>, vector<1x256xf32> -> vector<1x256xf32>
    %202 = arith.addf %198, %201 : vector<1x256xf32>
    %203 = vector.extract_strided_slice %169 {offsets = [8, 0], sizes = [1, 32], strides = [1, 1]} : vector<16x32xf32> to vector<1x32xf32>
    %c256 = arith.constant 256 : index
    %c0_98 = arith.constant 0 : index
    %204 = vector.load %arg21[%c256, %c0_98] : memref<512x256xf32, #tpu.memory_space<vmem>>, vector<32x256xf32>
    %cst_99 = arith.constant dense<0.000000e+00> : vector<1x256xf32>
    %205 = tpu.matmul %203, %204, %cst_99 {dimension_numbers = #tpu.dot_dimension_numbers<[1], [0], [0], [1], [0, 0, 1, 1], [], []>} : vector<1x32xf32>, vector<32x256xf32>, vector<1x256xf32> -> vector<1x256xf32>
    %206 = arith.addf %202, %205 : vector<1x256xf32>
    %207 = vector.extract_strided_slice %169 {offsets = [9, 0], sizes = [1, 32], strides = [1, 1]} : vector<16x32xf32> to vector<1x32xf32>
    %c288 = arith.constant 288 : index
    %c0_100 = arith.constant 0 : index
    %208 = vector.load %arg21[%c288, %c0_100] : memref<512x256xf32, #tpu.memory_space<vmem>>, vector<32x256xf32>
    %cst_101 = arith.constant dense<0.000000e+00> : vector<1x256xf32>
    %209 = tpu.matmul %207, %208, %cst_101 {dimension_numbers = #tpu.dot_dimension_numbers<[1], [0], [0], [1], [0, 0, 1, 1], [], []>} : vector<1x32xf32>, vector<32x256xf32>, vector<1x256xf32> -> vector<1x256xf32>
    %210 = arith.addf %206, %209 : vector<1x256xf32>
    %211 = vector.extract_strided_slice %169 {offsets = [10, 0], sizes = [1, 32], strides = [1, 1]} : vector<16x32xf32> to vector<1x32xf32>
    %c320 = arith.constant 320 : index
    %c0_102 = arith.constant 0 : index
    %212 = vector.load %arg21[%c320, %c0_102] : memref<512x256xf32, #tpu.memory_space<vmem>>, vector<32x256xf32>
    %cst_103 = arith.constant dense<0.000000e+00> : vector<1x256xf32>
    %213 = tpu.matmul %211, %212, %cst_103 {dimension_numbers = #tpu.dot_dimension_numbers<[1], [0], [0], [1], [0, 0, 1, 1], [], []>} : vector<1x32xf32>, vector<32x256xf32>, vector<1x256xf32> -> vector<1x256xf32>
    %214 = arith.addf %210, %213 : vector<1x256xf32>
    %215 = vector.extract_strided_slice %169 {offsets = [11, 0], sizes = [1, 32], strides = [1, 1]} : vector<16x32xf32> to vector<1x32xf32>
    %c352 = arith.constant 352 : index
    %c0_104 = arith.constant 0 : index
    %216 = vector.load %arg21[%c352, %c0_104] : memref<512x256xf32, #tpu.memory_space<vmem>>, vector<32x256xf32>
    %cst_105 = arith.constant dense<0.000000e+00> : vector<1x256xf32>
    %217 = tpu.matmul %215, %216, %cst_105 {dimension_numbers = #tpu.dot_dimension_numbers<[1], [0], [0], [1], [0, 0, 1, 1], [], []>} : vector<1x32xf32>, vector<32x256xf32>, vector<1x256xf32> -> vector<1x256xf32>
    %218 = arith.addf %214, %217 : vector<1x256xf32>
    %219 = vector.extract_strided_slice %169 {offsets = [12, 0], sizes = [1, 32], strides = [1, 1]} : vector<16x32xf32> to vector<1x32xf32>
    %c384 = arith.constant 384 : index
    %c0_106 = arith.constant 0 : index
    %220 = vector.load %arg21[%c384, %c0_106] : memref<512x256xf32, #tpu.memory_space<vmem>>, vector<32x256xf32>
    %cst_107 = arith.constant dense<0.000000e+00> : vector<1x256xf32>
    %221 = tpu.matmul %219, %220, %cst_107 {dimension_numbers = #tpu.dot_dimension_numbers<[1], [0], [0], [1], [0, 0, 1, 1], [], []>} : vector<1x32xf32>, vector<32x256xf32>, vector<1x256xf32> -> vector<1x256xf32>
    %222 = arith.addf %218, %221 : vector<1x256xf32>
    %223 = vector.extract_strided_slice %169 {offsets = [13, 0], sizes = [1, 32], strides = [1, 1]} : vector<16x32xf32> to vector<1x32xf32>
    %c416 = arith.constant 416 : index
    %c0_108 = arith.constant 0 : index
    %224 = vector.load %arg21[%c416, %c0_108] : memref<512x256xf32, #tpu.memory_space<vmem>>, vector<32x256xf32>
    %cst_109 = arith.constant dense<0.000000e+00> : vector<1x256xf32>
    %225 = tpu.matmul %223, %224, %cst_109 {dimension_numbers = #tpu.dot_dimension_numbers<[1], [0], [0], [1], [0, 0, 1, 1], [], []>} : vector<1x32xf32>, vector<32x256xf32>, vector<1x256xf32> -> vector<1x256xf32>
    %226 = arith.addf %222, %225 : vector<1x256xf32>
    %227 = vector.extract_strided_slice %169 {offsets = [14, 0], sizes = [1, 32], strides = [1, 1]} : vector<16x32xf32> to vector<1x32xf32>
    %c448 = arith.constant 448 : index
    %c0_110 = arith.constant 0 : index
    %228 = vector.load %arg21[%c448, %c0_110] : memref<512x256xf32, #tpu.memory_space<vmem>>, vector<32x256xf32>
    %cst_111 = arith.constant dense<0.000000e+00> : vector<1x256xf32>
    %229 = tpu.matmul %227, %228, %cst_111 {dimension_numbers = #tpu.dot_dimension_numbers<[1], [0], [0], [1], [0, 0, 1, 1], [], []>} : vector<1x32xf32>, vector<32x256xf32>, vector<1x256xf32> -> vector<1x256xf32>
    %230 = arith.addf %226, %229 : vector<1x256xf32>
    %231 = vector.extract_strided_slice %169 {offsets = [15, 0], sizes = [1, 32], strides = [1, 1]} : vector<16x32xf32> to vector<1x32xf32>
    %c480 = arith.constant 480 : index
    %c0_112 = arith.constant 0 : index
    %232 = vector.load %arg21[%c480, %c0_112] : memref<512x256xf32, #tpu.memory_space<vmem>>, vector<32x256xf32>
    %cst_113 = arith.constant dense<0.000000e+00> : vector<1x256xf32>
    %233 = tpu.matmul %231, %232, %cst_113 {dimension_numbers = #tpu.dot_dimension_numbers<[1], [0], [0], [1], [0, 0, 1, 1], [], []>} : vector<1x32xf32>, vector<32x256xf32>, vector<1x256xf32> -> vector<1x256xf32>
    %234 = arith.addf %230, %233 : vector<1x256xf32>
    %cst_114 = arith.constant 0.000000e+00 : f32
    %235 = vector.broadcast %cst_114 : f32 to vector<1x256xf32>
    %236 = arith.maximumf %234, %235 : vector<1x256xf32>
    %c0_115 = arith.constant 0 : index
    %c0_116 = arith.constant 0 : index
    %237 = vector.load %arg23[%c0_115, %c0_116] : memref<256x128xf32, #tpu.memory_space<vmem>>, vector<256x128xf32>
    %cst_117 = arith.constant dense<0.000000e+00> : vector<1x128xf32>
    %238 = tpu.matmul %236, %237, %cst_117 {dimension_numbers = #tpu.dot_dimension_numbers<[1], [0], [0], [1], [0, 0, 1, 1], [], []>} : vector<1x256xf32>, vector<256x128xf32>, vector<1x128xf32> -> vector<1x128xf32>
    %c0_118 = arith.constant 0 : index
    %c0_119 = arith.constant 0 : index
    %239 = vector.load %arg24[%c0_118, %c0_119] : memref<1x128xf32, #tpu.memory_space<vmem>>, vector<1x128xf32>
    %240 = arith.addf %238, %239 : vector<1x128xf32>
    %cst_120 = arith.constant 0.000000e+00 : f32
    %241 = vector.broadcast %cst_120 : f32 to vector<1x128xf32>
    %242 = arith.maximumf %240, %241 : vector<1x128xf32>
    %c0_121 = arith.constant 0 : index
    %c0_122 = arith.constant 0 : index
    %243 = vector.load %arg25[%c0_121, %c0_122] : memref<128x64xf32, #tpu.memory_space<vmem>>, vector<128x64xf32>
    %cst_123 = arith.constant dense<0.000000e+00> : vector<1x64xf32>
    %244 = tpu.matmul %242, %243, %cst_123 {dimension_numbers = #tpu.dot_dimension_numbers<[1], [0], [0], [1], [0, 0, 1, 1], [], []>} : vector<1x128xf32>, vector<128x64xf32>, vector<1x64xf32> -> vector<1x64xf32>
    %c0_124 = arith.constant 0 : index
    %c0_125 = arith.constant 0 : index
    %245 = vector.load %arg26[%c0_124, %c0_125] : memref<1x64xf32, #tpu.memory_space<vmem>>, vector<1x64xf32>
    %246 = arith.addf %244, %245 : vector<1x64xf32>
    %cst_126 = arith.constant 0.000000e+00 : f32
    %247 = vector.broadcast %cst_126 : f32 to vector<1x64xf32>
    %248 = arith.maximumf %246, %247 : vector<1x64xf32>
    %c0_127 = arith.constant 0 : index
    %c0_128 = arith.constant 0 : index
    %249 = vector.load %arg27[%c0_127, %c0_128] : memref<64x16xf32, #tpu.memory_space<vmem>>, vector<64x16xf32>
    %cst_129 = arith.constant dense<0.000000e+00> : vector<1x16xf32>
    %250 = tpu.matmul %248, %249, %cst_129 {dimension_numbers = #tpu.dot_dimension_numbers<[1], [0], [0], [1], [0, 0, 1, 1], [], []>} : vector<1x64xf32>, vector<64x16xf32>, vector<1x16xf32> -> vector<1x16xf32>
    %c0_130 = arith.constant 0 : index
    %c0_131 = arith.constant 0 : index
    %251 = vector.load %arg28[%c0_130, %c0_131] : memref<1x16xf32, #tpu.memory_space<vmem>>, vector<1x16xf32>
    %252 = arith.addf %250, %251 : vector<1x16xf32>
    %cst_132 = arith.constant 0.000000e+00 : f32
    %253 = vector.broadcast %cst_132 : f32 to vector<1x16xf32>
    %254 = arith.maximumf %252, %253 : vector<1x16xf32>
    %c0_133 = arith.constant 0 : index
    %c0_134 = arith.constant 0 : index
    %255 = vector.load %arg29[%c0_133, %c0_134] : memref<16x4xf32, #tpu.memory_space<vmem>>, vector<16x4xf32>
    %cst_135 = arith.constant dense<0.000000e+00> : vector<1x4xf32>
    %256 = tpu.matmul %254, %255, %cst_135 {dimension_numbers = #tpu.dot_dimension_numbers<[1], [0], [0], [1], [0, 0, 1, 1], [], []>} : vector<1x16xf32>, vector<16x4xf32>, vector<1x4xf32> -> vector<1x4xf32>
    %c0_136 = arith.constant 0 : index
    %c0_137 = arith.constant 0 : index
    %257 = vector.load %arg30[%c0_136, %c0_137] : memref<1x4xf32, #tpu.memory_space<vmem>>, vector<1x4xf32>
    %258 = arith.addf %256, %257 : vector<1x4xf32>
    %cst_138 = arith.constant 0.000000e+00 : f32
    %259 = vector.broadcast %cst_138 : f32 to vector<1x4xf32>
    %260 = arith.maximumf %258, %259 : vector<1x4xf32>
    %c0_139 = arith.constant 0 : index
    %c0_140 = arith.constant 0 : index
    %261 = vector.load %arg31[%c0_139, %c0_140] : memref<1x4xf32, #tpu.memory_space<vmem>>, vector<1x4xf32>
    %262 = arith.mulf %260, %261 : vector<1x4xf32>
    %cst_141 = arith.constant dense<0.000000e+00> : vector<1xf32>
    %263 = vector.multi_reduction <add>, %262, %cst_141 [1] : vector<1x4xf32> to vector<1xf32>
    %264 = vector.shape_cast %263 : vector<1xf32> to vector<1x1xf32>
    %c0_142 = arith.constant 0 : index
    %c0_143 = arith.constant 0 : index
    %265 = vector.load %arg32[%c0_142, %c0_143] : memref<1x1xf32, #tpu.memory_space<vmem>>, vector<1x1xf32>
    %266 = arith.addf %264, %265 : vector<1x1xf32>
    %c0_144 = arith.constant 0 : index
    %c0_145 = arith.constant 0 : index
    %c0_146 = arith.constant 0 : index
    %267 = vector.load %arg33[%c0_144, %c0_145, %c0_146] : memref<1x1x1xf32, #tpu.memory_space<vmem>>, vector<1x1x1xf32>
    %268 = vector.shape_cast %267 : vector<1x1x1xf32> to vector<1x1xf32>
    %269 = vector.shape_cast %266 : vector<1x1xf32> to vector<1x1x1xf32>
    tpu.vector_store %arg33[%c0_144, %c0_145, %c0_146], %269 {strides = array<i32>} : memref<1x1x1xf32, #tpu.memory_space<vmem>>, vector<1x1x1xf32>,
    return
  }
  func.func @transform_0(%arg0: i32) -> (i32, i32, i32) {
    %c0_i32 = arith.constant 0 : i32
    %c0_i32_0 = arith.constant 0 : i32
    %c0_i32_1 = arith.constant 0 : i32
    return %arg0, %c0_i32, %c0_i32_0 : i32, i32, i32
  }
  func.func @transform_1(%arg0: i32) -> (i32, i32, i32) {
    %c0_i32 = arith.constant 0 : i32
    %c0_i32_0 = arith.constant 0 : i32
    %c0_i32_1 = arith.constant 0 : i32
    return %arg0, %c0_i32, %c0_i32_0 : i32, i32, i32
  }
  func.func @transform_2(%arg0: i32) -> (i32, i32) {
    %c0_i32 = arith.constant 0 : i32
    %c0_i32_0 = arith.constant 0 : i32
    %c0_i32_1 = arith.constant 0 : i32
    return %c0_i32, %c0_i32_0 : i32, i32
  }
  func.func @transform_3(%arg0: i32) -> (i32, i32) {
    %c0_i32 = arith.constant 0 : i32
    %c0_i32_0 = arith.constant 0 : i32
    %c0_i32_1 = arith.constant 0 : i32
    return %c0_i32, %c0_i32_0 : i32, i32
  }
  func.func @transform_4(%arg0: i32) -> (i32, i32) {
    %c0_i32 = arith.constant 0 : i32
    %c0_i32_0 = arith.constant 0 : i32
    %c0_i32_1 = arith.constant 0 : i32
    return %c0_i32, %c0_i32_0 : i32, i32
  }
  func.func @transform_5(%arg0: i32) -> (i32, i32) {
    %c0_i32 = arith.constant 0 : i32
    %c0_i32_0 = arith.constant 0 : i32
    %c0_i32_1 = arith.constant 0 : i32
    return %c0_i32, %c0_i32_0 : i32, i32
  }
  func.func @transform_6(%arg0: i32) -> (i32, i32) {
    %c0_i32 = arith.constant 0 : i32
    %c0_i32_0 = arith.constant 0 : i32
    %c0_i32_1 = arith.constant 0 : i32
    return %c0_i32, %c0_i32_0 : i32, i32
  }
  func.func @transform_7(%arg0: i32) -> (i32, i32) {
    %c0_i32 = arith.constant 0 : i32
    %c0_i32_0 = arith.constant 0 : i32
    %c0_i32_1 = arith.constant 0 : i32
    return %c0_i32, %c0_i32_0 : i32, i32
  }
  func.func @transform_8(%arg0: i32) -> (i32, i32) {
    %c0_i32 = arith.constant 0 : i32
    %c0_i32_0 = arith.constant 0 : i32
    %c0_i32_1 = arith.constant 0 : i32
    return %c0_i32, %c0_i32_0 : i32, i32
  }
  func.func @transform_9(%arg0: i32) -> (i32, i32) {
    %c0_i32 = arith.constant 0 : i32
    %c0_i32_0 = arith.constant 0 : i32
    %c0_i32_1 = arith.constant 0 : i32
    return %c0_i32, %c0_i32_0 : i32, i32
  }
  func.func @transform_10(%arg0: i32) -> (i32, i32) {
    %c0_i32 = arith.constant 0 : i32
    %c0_i32_0 = arith.constant 0 : i32
    %c0_i32_1 = arith.constant 0 : i32
    return %c0_i32, %c0_i32_0 : i32, i32
  }
  func.func @transform_11(%arg0: i32) -> (i32, i32) {
    %c0_i32 = arith.constant 0 : i32
    %c0_i32_0 = arith.constant 0 : i32
    %c0_i32_1 = arith.constant 0 : i32
    return %c0_i32, %c0_i32_0 : i32, i32
  }
  func.func @transform_12(%arg0: i32) -> (i32, i32) {
    %c0_i32 = arith.constant 0 : i32
    %c0_i32_0 = arith.constant 0 : i32
    %c0_i32_1 = arith.constant 0 : i32
    return %c0_i32, %c0_i32_0 : i32, i32
  }
  func.func @transform_13(%arg0: i32) -> (i32, i32) {
    %c0_i32 = arith.constant 0 : i32
    %c0_i32_0 = arith.constant 0 : i32
    %c0_i32_1 = arith.constant 0 : i32
    return %c0_i32, %c0_i32_0 : i32, i32
  }
  func.func @transform_14(%arg0: i32) -> (i32, i32) {
    %c0_i32 = arith.constant 0 : i32
    %c0_i32_0 = arith.constant 0 : i32
    %c0_i32_1 = arith.constant 0 : i32
    return %c0_i32, %c0_i32_0 : i32, i32
  }
  func.func @transform_15(%arg0: i32) -> (i32, i32) {
    %c0_i32 = arith.constant 0 : i32
    %c0_i32_0 = arith.constant 0 : i32
    %c0_i32_1 = arith.constant 0 : i32
    return %c0_i32, %c0_i32_0 : i32, i32
  }
  func.func @transform_16(%arg0: i32) -> (i32, i32) {
    %c0_i32 = arith.constant 0 : i32
    %c0_i32_0 = arith.constant 0 : i32
    %c0_i32_1 = arith.constant 0 : i32
    return %c0_i32, %c0_i32_0 : i32, i32
  }
  func.func @transform_17(%arg0: i32) -> (i32, i32) {
    %c0_i32 = arith.constant 0 : i32
    %c0_i32_0 = arith.constant 0 : i32
    %c0_i32_1 = arith.constant 0 : i32
    return %c0_i32, %c0_i32_0 : i32, i32
  }
  func.func @transform_18(%arg0: i32) -> (i32, i32) {
    %c0_i32 = arith.constant 0 : i32
    %c0_i32_0 = arith.constant 0 : i32
    %c0_i32_1 = arith.constant 0 : i32
    return %c0_i32, %c0_i32_0 : i32, i32
  }
  func.func @transform_19(%arg0: i32) -> (i32, i32) {
    %c0_i32 = arith.constant 0 : i32
    %c0_i32_0 = arith.constant 0 : i32
    %c0_i32_1 = arith.constant 0 : i32
    return %c0_i32, %c0_i32_0 : i32, i32
  }
  func.func @transform_20(%arg0: i32) -> (i32, i32) {
    %c0_i32 = arith.constant 0 : i32
    %c0_i32_0 = arith.constant 0 : i32
    %c0_i32_1 = arith.constant 0 : i32
    return %c0_i32, %c0_i32_0 : i32, i32
  }
  func.func @transform_21(%arg0: i32) -> (i32, i32) {
    %c0_i32 = arith.constant 0 : i32
    %c0_i32_0 = arith.constant 0 : i32
    %c0_i32_1 = arith.constant 0 : i32
    return %c0_i32, %c0_i32_0 : i32, i32
  }
  func.func @transform_22(%arg0: i32) -> (i32, i32) {
    %c0_i32 = arith.constant 0 : i32
    %c0_i32_0 = arith.constant 0 : i32
    %c0_i32_1 = arith.constant 0 : i32
    return %c0_i32, %c0_i32_0 : i32, i32
  }
  func.func @transform_23(%arg0: i32) -> (i32, i32) {
    %c0_i32 = arith.constant 0 : i32
    %c0_i32_0 = arith.constant 0 : i32
    %c0_i32_1 = arith.constant 0 : i32
    return %c0_i32, %c0_i32_0 : i32, i32
  }
  func.func @transform_24(%arg0: i32) -> (i32, i32) {
    %c0_i32 = arith.constant 0 : i32
    %c0_i32_0 = arith.constant 0 : i32
    %c0_i32_1 = arith.constant 0 : i32
    return %c0_i32, %c0_i32_0 : i32, i32
  }
  func.func @transform_25(%arg0: i32) -> (i32, i32) {
    %c0_i32 = arith.constant 0 : i32
    %c0_i32_0 = arith.constant 0 : i32
    %c0_i32_1 = arith.constant 0 : i32
    return %c0_i32, %c0_i32_0 : i32, i32
  }
  func.func @transform_26(%arg0: i32) -> (i32, i32) {
    %c0_i32 = arith.constant 0 : i32
    %c0_i32_0 = arith.constant 0 : i32
    %c0_i32_1 = arith.constant 0 : i32
    return %c0_i32, %c0_i32_0 : i32, i32
  }
  func.func @transform_27(%arg0: i32) -> (i32, i32) {
    %c0_i32 = arith.constant 0 : i32
    %c0_i32_0 = arith.constant 0 : i32
    %c0_i32_1 = arith.constant 0 : i32
    return %c0_i32, %c0_i32_0 : i32, i32
  }
  func.func @transform_28(%arg0: i32) -> (i32, i32) {
    %c0_i32 = arith.constant 0 : i32
    %c0_i32_0 = arith.constant 0 : i32
    %c0_i32_1 = arith.constant 0 : i32
    return %c0_i32, %c0_i32_0 : i32, i32
  }
  func.func @transform_29(%arg0: i32) -> (i32, i32) {
    %c0_i32 = arith.constant 0 : i32
    %c0_i32_0 = arith.constant 0 : i32
    %c0_i32_1 = arith.constant 0 : i32
    return %c0_i32, %c0_i32_0 : i32, i32
  }
  func.func @transform_30(%arg0: i32) -> (i32, i32) {
    %c0_i32 = arith.constant 0 : i32
    %c0_i32_0 = arith.constant 0 : i32
    %c0_i32_1 = arith.constant 0 : i32
    return %c0_i32, %c0_i32_0 : i32, i32
  }
  func.func @transform_31(%arg0: i32) -> (i32, i32) {
    %c0_i32 = arith.constant 0 : i32
    %c0_i32_0 = arith.constant 0 : i32
    %c0_i32_1 = arith.constant 0 : i32
    return %c0_i32, %c0_i32_0 : i32, i32
  }
  func.func @transform_32(%arg0: i32) -> (i32, i32, i32) {
    %c0_i32 = arith.constant 0 : i32
    %c0_i32_0 = arith.constant 0 : i32
    %c0_i32_1 = arith.constant 0 : i32
    return %arg0, %c0_i32, %c0_i32_0 : i32, i32, i32
  }
}

</mosaic_0001>

<bundles_post_ra>
// kernel: tpu_custom_call.1
= control target key start
LH: loop header
LB: loop body
LE: loop exit
PB: predicated region body
PF: predicated region fallthrough
CT: control target
= control target key end

     0   :  { %s5547_s6 = smov 1   ;;  %s5548_s10 = smov 2   ;;  %s6238_s0 = inlined_call_operand.smem [shape: u32[33], index: -1, kind: input, shape index: {}] }
   0x1   :  { %s5601_s5 = sld [smem:[%s6238_s0]]   ;;  %s5549_s14 = smov 3  }
   0x2   :  { %s5606_s9 = sld [smem:[%s6238_s0 + %s5547_s6]]   ;;  %s5550_s18 = smov 4  }
   0x3   :  { %s5611_s13 = sld [smem:[%s6238_s0 + %s5548_s10]]   ;;  %s5551_s22 = smov 5  }
   0x4   :  { %s5616_s17 = sld [smem:[%s6238_s0 + %s5549_s14]]   ;;  %s5552_s26 = smov 6  }
   0x5   :  { %s5621_s21 = sld [smem:[%s6238_s0 + %s5550_s18]]   ;;  %s5553_s30 = smov 7  }
   0x6   :  { %s5626_s25 = sld [smem:[%s6238_s0 + %s5551_s22]]   ;;  %s5554_s4 = smov 8  }
   0x7   :  { %s5631_s29 = sld [smem:[%s6238_s0 + %s5552_s26]]   ;;  %s5555_s10 = smov 9  }
   0x8   :  { %s5636_s3 = sld [smem:[%s6238_s0 + %s5553_s30]]   ;;  %s5556_s15 = smov 10  }
   0x9   :  { %s5641_s8 = sld [smem:[%s6238_s0 + %s5554_s4]]   ;;  %s5557_s20 = smov 11  }
   0xa   :  { %s5646_s14 = sld [smem:[%s6238_s0 + %s5555_s10]]   ;;  %s5558_s26 = smov 12  }
   0xb   :  { %s5651_s19 = sld [smem:[%s6238_s0 + %s5556_s15]]   ;;  %s5559_s1 = smov 13  }
   0xc   :  { %s5656_s24 = sld [smem:[%s6238_s0 + %s5557_s20]]   ;;  %s5560_s7 = smov 14  }
   0xd   :  { %s5661_s30 = sld [smem:[%s6238_s0 + %s5558_s26]]   ;;  %s5561_s15 = smov 15  }
   0xe   :  { %s5666_s6 = sld [smem:[%s6238_s0 + %s5559_s1]]   ;;  %s5562_s22 = smov 16  }
   0xf   :  { %s5671_s12 = sld [smem:[%s6238_s0 + %s5560_s7]]   ;;  %s5563_s28 = smov 17  }
  0x10   :  { %s5676_s20 = sld [smem:[%s6238_s0 + %s5561_s15]]   ;;  %s5564_s7 = smov 18  }
  0x11   :  { %s5681_s27 = sld [smem:[%s6238_s0 + %s5562_s22]]   ;;  %s5565_s15 = smov 19  }
  0x12   :  { %s5686_s4 = sld [smem:[%s6238_s0 + %s5563_s28]]   ;;  %s5566_s22 = smov 20  }
  0x13   :  { %6246 = sst [smem:[#allocation6_spill]] %s5661_s30  ;;  %s5567_s28 = smov 21  }
  0x14   :  { %6247 = sst [smem:[#allocation7_spill]] %s5666_s6  ;;  %s5578_s23 = smov 32  }
  0x15   :  { %s5691_s6 = sld [smem:[%s6238_s0 + %s5564_s7]]   ;;  %s5568_s7 = smov 22  }
  0x16   :  { %6248 = sst [smem:[#allocation8_spill]] %s5676_s20 }
  0x17   :  { %6249 = sst [smem:[#allocation9_spill]] %s5681_s27 }
  0x18   :  { %6250 = sst [smem:[#allocation10_spill]] %s5686_s4 }
  0x19   :  { %s5696_s20 = sld [smem:[%s6238_s0 + %s5565_s15]]   ;;  %s5569_s15 = smov 23  }
  0x1a   :  { %s5701_s30 = sld [smem:[%s6238_s0 + %s5566_s22]]   ;;  %s5570_s22 = smov 24  }
  0x1b   :  { %6251 = sst [smem:[#allocation11_spill]] %s5691_s6 }
  0x1c   :  { %s5706_s4 = sld [smem:[%s6238_s0 + %s5567_s28]]   ;;  %s5571_s28 = smov 25  }
  0x1d   :  { %s5711_s6 = sld [smem:[%s6238_s0 + %s5568_s7]]   ;;  %s5572_s7 = smov 26  }
  0x1e   :  { %s5721_s27 = sld [smem:[%s6238_s0 + %s5570_s22]]   ;;  %s5574_s22 = smov 28  }
  0x1f   :  { %6252 = sst [smem:[#allocation12_spill]] %s5696_s20 }
  0x20   :  { %s5716_s20 = sld [smem:[%s6238_s0 + %s5569_s15]]   ;;  %s5573_s15 = smov 27  }
  0x22   :  { %6253 = sst [smem:[#allocation13_spill]] %s5706_s4 }
  0x23   :  { %6254 = sst [smem:[#allocation14_spill]] %s5711_s6 }
  0x24   :  { %6256 = sst [smem:[#allocation16_spill]] %s5721_s27 }
  0x25   :  { %s5726_s4 = sld [smem:[%s6238_s0 + %s5571_s28]]   ;;  %s5575_s28 = smov 29  }
  0x26   :  { %6255 = sst [smem:[#allocation15_spill]] %s5716_s20 }
  0x27   :  { %s5731_s6 = sld [smem:[%s6238_s0 + %s5572_s7]]   ;;  %s5576_s7 = smov 30  }
  0x28   :  { %s5736_s20 = sld [smem:[%s6238_s0 + %s5573_s15]]   ;;  %s5577_s15 = smov 31  }
  0x29   :  { %s5741_s27 = sld [smem:[%s6238_s0 + %s5574_s22]]  }
  0x2b   :  { %6257 = sst [smem:[#allocation17_spill]] %s5726_s4 }
  0x2c   :  { %s5746_s4 = sld [smem:[%s6238_s0 + %s5575_s28]]  }
  0x2d   :  { %6258 = sst [smem:[#allocation18_spill]] %s5731_s6 }
  0x2e   :  { %6259 = sst [smem:[#allocation19_spill]] %s5736_s20 }
  0x2f   :  { %6260 = sst [smem:[#allocation20_spill]] %s5741_s27 }
  0x30   :  { %s5751_s6 = sld [smem:[%s6238_s0 + %s5576_s7]]  }
  0x31   :  { %s4664_s20 = sld [smem:[%s6238_s0 + %s5577_s15]]  }
  0x32   :  { %s5759_s27 = sld [smem:[%s6238_s0 + %s5578_s23]]  }
  0x37   :  { %v70_v0 = vstv %s4664_s20 }
  0x38   :  { %71 = vst [vmem:[#allocation2] sm:$0x1] %v70_v0 }
  0x39   :  { %72 = vsyncpa [#allocation4], 0  ;;  %s5761_s28 = smov 0  }
  0x3a LB: > { %s5767_s1 = sadd.s32 4294967295, %s5545_s28   ;;  %p4668_p0 = scmp.ge.s32.totalorder %s5545_s28, 1  ;;  %s5545_s28 = sphi %s5761_s28, %s78_s28  }
  0x3b   : > { %p791_p1 = scmp.lt.s32.totalorder %s5545_s28, 3  ;;  %s5579_s0 = smov [#allocation3]  }
  0x3c   : > { %s857_s20 = sshll.u32 %s5579_s0, 4  ;;  %p6245_p3 = scmp.eq.s32.totalorder %s5767_s1, 0  ;;  %s858_s20 = int_to_ptr.vmem [resolvable:$true] %s857_s20 }
  0x3d   : > { %p5771_p2 = pnand %p4668_p0, %p791_p1  ;;  %s5507_s10 = scalar_lea.hbm %s5701_s30, 16384 }
  0x3e   : > { %p5508_p6 = scmp.ne.s32.totalorder %s5701_s30, %s5507_s10  ;;  %p5514_p10 = scmp.lt.u32.totalorder %s5507_s10, %s5701_s30 }
  0x3f   : > { %s6261_s2 = scalar_select %p5771_p2, 1, 0 }
  0x40   : > { %p5376_p4 = pneg %p5771_p2 }
  0x42   : > { %p5780_p5 = pnand %p6245_p3, %p5376_p4 }
  0x44   : > { %p5509_p7 = pneg %p5780_p5 }
  0x46   : > { %p5510_p8 = pnand %p5509_p7, %p5508_p6 }
  0x48   : > { %p5511_p9 = pneg %p5510_p8 }
  0x4a   : > { %p5516_p11 = pnand %p5514_p10, %p5511_p9 }
  0x4c   : > { %5519 = shalt.err (!%p5516_p11)
}
  0x4d   : > { %s5520_s11 = scalar_lea.vmem %s858_s20, 16384  ;;  %p5528_p1 = scmp.lt.s32.totalorder %s858_s20, %s858_s20 }
  0x4e   : > { %p5521_p12 = scmp.ne.s32.totalorder %s858_s20, %s5520_s11  ;;  %p5529_p2 = scmp.lt.s32.totalorder %s5520_s11, %s5520_s11 }
  0x50   : > { %p5523_p13 = pnand %p5521_p12, %p5509_p7  ;;  %p5530_p4 = por %p5529_p2, %p5528_p1 }
  0x52   : > { %p5524_p0 = pneg %p5523_p13 }
  0x54   : > { %p5531_p3 = pnand %p5530_p4, %p5524_p0 }
  0x56   : > { %5534 = shalt.err (!%p5531_p3)
}
  0x57   : > { %s5580_s15 = smov 256   ;;  %s5581_s16 = smov 16  }
  0x58   : > { %5379 = dma.hbm_to_vmem [thread:$0]  (!%p5780_p5), %s5701_s30, 16384, %s858_s20, [#allocation4], %s5580_s15, %s5580_s15, %s5581_s16  }
  0x59   : > { %p6263_p6 = scmp.ne.s32.totalorder %s6261_s2, 0 }
  0x5a   : > { %p6264_p8 = scmp.eq.s32.totalorder (!%p6263_p6), %s5767_s1, 0 }
  0x5b   : > { %920 = sbr.rel (%p6263_p6) target bundleno = 5137 (0x1411), region = 148 }
  0x62   : > { %5540 = dma.done.wait (%p6264_p8), [#allocation4], 16384   ;;  %p6265_p7 = pmov %p6264_p8 }
  0x63   : > { %p1003_p2 = scmp.lt.s32.totalorder %s5767_s1, 1  ;;  %v5582_v1 = vmov 0   ;;  %v1053_v4 = vld [vmem:[%s5621_s21] sm:$0xff]  ;;  %v1054_v5 = vld [vmem:[%s5621_s21 + $0x8] sm:$0xff]  ;;  %v1055_v10 = vld [vmem:[%s5621_s21 + $0x10] sm:$0xff]  ;;  %p1008_p3 = scmp.lt.s32.totalorder %s5767_s1, 15  ;;  %v1318_v59 = vlaneseq }
  0x64   : > { %5542 = vsyncadd (%p6265_p7), [#allocation4], 4294950912  ;;  %5436 = vset.pattern.permute.xlu0 %v5582_v1  ;;  %v1232_v6 = vld [vmem:[%s5631_s29] sm:$0xff]  ;;  %v1233_v7 = vld [vmem:[%s5631_s29 + $0x8] sm:$0xff]  ;;  %v5061_v8 = vpack.c.bf16 %v1054_v5, %v1053_v4  ;;  %vm1064_vm0 = vcmask 261120   ;;  %vm1327_vm1 = vcmask 64512  }
  0x65   : > { %s5800_s18 = scalar_select %p1003_p2, %s5767_s1, 1  ;;  %v5077_v9 = vpack.c.bf16 %v1233_v7, %v1232_v6  ;;  %v1056_v11 = vld [vmem:[%s5621_s21 + $0x18] sm:$0xff]  ;;  %v1234_v13 = vld [vmem:[%s5631_s29 + $0x10] sm:$0xff]  ;;  %v1146_v16 = vld [vmem:[%s5626_s25] sm:$0xff]  ;;  %v5874_v60 = vshrl.u32 %v1318_v59, 7  ;;  %v1322_v62 = vand.u32 127, %v1318_v59 }
  0x66   : > { %v5065_v12 = vpack.c.bf16 %v1056_v11, %v1055_v10  ;;  %v1235_v14 = vld [vmem:[%s5631_s29 + $0x18] sm:$0xff]  ;;  %5062 = vmatprep.subr.bf16.mxu1 %v5061_v8  ;;  %v1147_v17 = vld [vmem:[%s5626_s25 + $0x8] sm:$0xff]  ;;  %s6284_s1 = smov (!%p1008_p3, %s5767_s1), 15  ;;  %v4675_v19 = vld [vmem:[%s5611_s13] ss:$0 sm:$0xff]  ;;  %v5584_v0 = vmov 0.0  }
  0x67   : > { %s4741_s23 = sshll.u32 %s5800_s18, 4  ;;  %v5081_v15 = vpack.c.bf16 %v1235_v14, %v1234_v13  ;;  %5064 = vmatpush3.bf16.msra.mxu1 %v5061_v8  ;;  %5078 = vmatprep.subr.bf16.mxu0 %v5077_v9  ;;  %v5069_v18 = vpack.c.bf16 %v1147_v17, %v1146_v16  ;;  %s1010_s26 = scalar_lea.vmem %s5606_s9, %s6284_s1  ;;  %v4676_v20 = vld [vmem:[%s5616_s17] ss:$0 sm:$0xff]  ;;  %v1148_v28 = vld [vmem:[%s5626_s25 + $0x10] sm:$0xff]  ;;  %v1149_v29 = vld [vmem:[%s5626_s25 + $0x18] sm:$0xff]  ;;  %v1320_v61 = vadd.s32 8, %v5874_v60  ;;  %vm1323_vm4 = vcmp.gt.s32.totalorder %v1322_v62, %v5874_v60 }
  0x68   : > { %s1007_s22 = scalar_lea.vmem %s5601_s5, %s4741_s23  ;;  %5080 = vmatpush3.bf16.msra.mxu0 %v5077_v9  ;;  %5066 = vmatprep.subr.bf16.mxu1 %v5065_v12  ;;  %v4677_v23 = vld [vmem:[%s1010_s26] ss:$0 sm:$0xff]  ;;  %v5073_v32 = vpack.c.bf16 %v1149_v29, %v1148_v28  ;;  %s5583_s1 = smov 120   ;;  %vm5852_vm2 = vmpackc.low %vm1327_vm1, %vm1327_vm1  ;;  %v5882_v4 = vsel %vm1323_vm4, -1e+30, %v5584_v0  ;;  %vm1419_vm5 = vcmask 130048  }
  0x69   : > { %v1014_v2 = vld [vmem:[%s1007_s22] sm:$0xff]  ;;  %v1015_v3 = vld [vmem:[%s1007_s22 + $0x8] sm:$0xff]  ;;  %5082 = vmatprep.subr.bf16.mxu0 %v5081_v15  ;;  %vm1324_vm3 = vcmp.gt.s32.totalorder %v1322_v62, %v1320_v61  ;;  %s5585_s0 = smov 112   ;;  %s5586_s20 = smov 104   ;;  %vm2165_vm6 = vcmask 195584   ;;  %vm5592_vm7 = vmmov 0  }
  0x6a   : > { %1019 = vperm.xlu0 %5436, %v1014_v2   ;;  %v4678_v33 = vld [vmem:[%s5636_s3] ss:$0 sm:$0xff]  ;;  %v5879_v1 = vsel %vm1324_vm3, -1e+30, %v5584_v0  ;;  %s5587_s2 = smov 8   ;;  %s5588_s7 = smov 16  }
  0x6b   : > { %5068 = vmatpush3.bf16.msra.mxu1 %v5065_v12  ;;  %v4684_v34 = vld [vmem:[%s5646_s14] ss:$0 sm:$0xff]  ;;  %s5589_s10 = smov 24   ;;  %s6268_s11 = sld [smem:[#allocation9_spill]]  ;;  %vm4404_vm8 = vcmask 523264   ;;  %vm4558_vm9 = vcmask 24576  }
  0x6c   : > { %5084 = vmatpush3.bf16.msra.mxu0 %v5081_v15  ;;  %5070 = vmatprep.subr.bf16.mxu1 %v5069_v18  ;;  %v4681_v45 = vld [vmem:[%s5641_s8] ss:$0 sm:$0xff]  ;;  %s6269_s15 = sld [smem:[#allocation6_spill]]  ;;  %s6270_s16 = sld [smem:[#allocation7_spill]]  ;;  %vm4564_vm10 = vcmask 0  }
  0x6d   : > { %s6271_s23 = sld [smem:[#allocation8_spill]]  ;;  %s6272_s22 = sld [smem:[#allocation10_spill]] }
  0x6e   : > { %1024 = vperm.xlu0 %5436, %v1015_v3   ;;  %s6273_s26 = sld [smem:[#allocation11_spill]] }
  0xe9   : > { %v1020_v21 = vpop.permute.xlu0 %1019 }
  0xea   : > { %v1033_v22 = vmul.f32 %v4675_v19, %v1020_v21 }
  0xec   : > { %v1042_v24 = vadd.f32 %v4676_v20, %v1033_v22 }
  0xed   : > { %v1025_v25 = vpop.permute.xlu0 %1024 }
  0xee   : > { %v5819_v26 = vadd.f32 %v4677_v23, %v1042_v24  ;;  %v1034_v27 = vmul.f32 %v4675_v19, %v1025_v25 }
  0xf0   : > { %v1043_v30 = vadd.f32 %v4676_v20, %v1034_v27  ;;  %4908 = vmatprep.mubr.msk.f32.mxu1 %vm1064_vm0, %v5819_v26  ;;  %4930 = vmatprep.mubr.msk.f32.mxu0 %vm1064_vm0, %v5819_v26 }
  0xf2   : > { %v5827_v31 = vadd.f32 %v4677_v23, %v1043_v30 }
  0xf4   : > { %4909 = vmatmul.mubr.msk.f32.vlgmr.msra.gmra.mrb[0].mxu1 %vm1064_vm0, %v5827_v31  ;;  %4931 = vmatmul.mubr.msk.f32.vlgmr.msra.gmra.mrb[0].mxu0 %vm1064_vm0, %v5827_v31 }
  0xf5   : > { %5072 = vmatpush3.bf16.msra.mxu1 %v5069_v18  ;;  %4919 = vmatprep.mubr.msk.f32.mxu1 %vm1064_vm0, %v5819_v26 }
  0xf6   : > { %5074 = vmatprep.subr.bf16.mxu1 %v5073_v32 }
  0xf9   : > { %5076 = vmatpush3.bf16.msra.mxu1 %v5073_v32 }
  0xfc   : > { %4920 = vmatmul.mubr.msk.f32.vlgmr.msra.gmra.mrb[2].mxu1 %vm1064_vm0, %v5827_v31 }
 0x1c7   : > { %v4910_v35 = vpop.f32.mrb[0].mxu1  ;;  %v4932_v36 = vpop.f32.mrb[0].mxu0 }
 0x1c8   : > { %v5839_v37 = vadd.f32 %v4910_v35, %v4678_v33  ;;  %v1315_v38 = vadd.f32 %v4932_v36, %v4684_v34  ;;  %v1137_v39 = vpop.f32.mrb[1].mxu1  ;;  %v1309_v40 = vpop.f32.mrb[1].mxu0 }
 0x1c9   : > { %v5841_v41 = vadd.f32 %v4678_v33, %v1137_v39  ;;  %v1310_v42 = vadd.f32 %v4684_v34, %v1309_v40 }
 0x1ca   : > { %1525 = vrot.lane.b32.xlu0 %v5839_v37, %s5583_s1 }
 0x1cb   : > { %4937 = vmatprep.mubr.msk.f32.mxu1 %vm1327_vm1, %v5841_v41  ;;  %v5091_v43 = vpack.c.bf16 %v1315_v38, %v1310_v42  ;;  %v5847_v44 = vpack.i.bf16 %v1315_v38, %v1310_v42 }
 0x1cd   : > { %5092 = vmatprep.subr.bf16.mxu0 %v5091_v43 }
 0x1ce   : > { %5094 = vmatpush3.bf16.msra.mxu0 %v5091_v43 }
 0x1cf   : > { %v4921_v46 = vpop.f32.mrb[2].mxu1 }
 0x1d0   : > { %v1229_v47 = vadd.f32 %v4921_v46, %v4681_v45  ;;  %v1223_v48 = vpop.f32.mrb[3].mxu1 }
 0x1d1   : > { %v1224_v49 = vadd.f32 %v4681_v45, %v1223_v48 }
 0x1d3   : > { %v5856_v51 = vpack.i.bf16 %v1229_v47, %v1224_v49  ;;  %v5085_v52 = vpack.c.bf16 %v1229_v47, %v1224_v49 }
 0x1d5   : > { %5438 = vrot.lane.b32.xlu1 %v5856_v51, %s5583_s1  ;;  %5087 = vmatprep.subr.msk.bf16.mxu1 %vm5852_vm2, %v5085_v52 }
 0x1d6   : > { %5090 = vmatpush3.bf16.xpose.msk.msra.mxu1 %vm5852_vm2, %v5085_v52 }
 0x1d9   : > { %1523 = vrot.lane.b32.xlu1 %v5841_v41, %s5583_s1 }
 0x1dd   : > { %4938 = vmatmul.mubr.msk.f32.vlgmr.msra.gmra.mrb[4].mxu1 %vm1327_vm1, %v5839_v37 }
 0x23c   : > { %v1526_v58 = vpop.permute.xlu0 %1525 }
 0x247   : > { %v5439_v53 = vpop.permute.xlu1 %5438 }
 0x248   : > { %v5441_v54 = vunpack.i.h.bf16 %v5439_v53  ;;  %v5440_v55 = vunpack.i.l.bf16 %v5439_v53 }
 0x24a   : > { %v5095_v56 = vpack.c.bf16 %v5441_v54, %v5440_v55 }
 0x24b   : > { %v1524_v57 = vpop.permute.xlu1 %1523 }
 0x24c   : > { %5097 = vmatprep.subr.msk.bf16.mxu1 %vm5852_vm2, %v5095_v56  ;;  %4951 = vmatprep.mubr.msk.f32.mxu1 %vm1327_vm1, %v1524_v57 }
 0x24d   : > { %5100 = vmatpush3.bf16.xpose.msk.msra.mxu1 %vm5852_vm2, %v5095_v56 }
 0x254   : > { %4952 = vmatmul.mubr.msk.f32.vlgmr.msra.gmra.mrb[6].mxu1 %vm1327_vm1, %v1526_v58 }
 0x2b0   : > { %v4939_v63 = vpop.f32.mrb[4].mxu1 }
 0x2b1   : > { %v1416_v2 = vmul.f32 0.35355338, %v4939_v63  ;;  %v1406_v3 = vpop.f32.mrb[5].mxu1 }
 0x2b2   : > { %v1415_v5 = vmul.f32 0.35355338, %v1406_v3 }
 0x2b3   : > { %v1418_v6 = vadd.f32 %v1416_v2, %v5879_v1 }
 0x2b4   : > { %v1417_v7 = vadd.f32 %v1415_v5, %v5882_v4 }
 0x2b5   : > { %v1423_v8 = vsel %vm1419_vm5, %v1418_v6, -inf }
 0x2b6   : > { %1424 = vmax.xlane.f32.xlu0 %v1423_v8  ;;  %v1420_v9 = vsel %vm1419_vm5, %v1417_v7, -inf }
 0x2b7   : > { %1421 = vmax.xlane.f32.xlu1 %v1420_v9 }
 0x327   : > { %v4953_v10 = vpop.f32.mrb[6].mxu1 }
 0x328   : > { %v1615_v11 = vmul.f32 0.35355338, %v4953_v10  ;;  %v1605_v12 = vpop.f32.mrb[7].mxu1 }
 0x329   : > { %v1614_v13 = vmul.f32 0.35355338, %v1605_v12 }
 0x32a   : > { %v1617_v14 = vadd.f32 %v1615_v11, %v5879_v1 }
 0x32b   : > { %v1616_v15 = vadd.f32 %v1614_v13, %v5882_v4 }
 0x32c   : > { %v1621_v16 = vsel %vm1419_vm5, %v1617_v14, -inf }
 0x32d   : > { %1622 = vmax.xlane.f32.xlu1 %v1621_v16  ;;  %v1618_v17 = vsel %vm1419_vm5, %v1616_v15, -inf }
 0x32e   : > { %1619 = vmax.xlane.f32.xlu0 %v1618_v17 }
 0x343   : > { %v1425_v18 = vpop.xlane.xlu0 %1424 }
 0x344   : > { %v1427_v19 = vsub.f32 %v1418_v6, %v1425_v18  ;;  %v1422_v20 = vpop.xlane.xlu1 %1421 }
 0x345   : > { %v1426_v21 = vsub.f32 %v1417_v7, %v1422_v20 }
 0x346   : > { %v1430_v22 = vmul.f32 1.442695, %v1427_v19 }
 0x347   : > { %v1428_v23 = vmul.f32 1.442695, %v1426_v21 }
 0x348   : > { %5467 = vpow2.f32 %v1430_v22 }
 0x349   : > { %5469 = vpow2.f32 %v1428_v23 }
 0x352   : > { %v5468_v24 = vpop.eup %5467 }
 0x353   : > { %v5470_v25 = vpop.eup %5469  ;;  %v1435_v27 = vsel %vm1419_vm5, %v5468_v24, 0.0 }
 0x354   : > { %1436 = vadd.xlane.f32.xlu1 %v1435_v27  ;;  %v1432_v28 = vsel %vm1419_vm5, %v5470_v25, 0.0 }
 0x355   : > { %1433 = vadd.xlane.f32.xlu0 %v1432_v28 }
 0x3ba   : > { %v1623_v29 = vpop.xlane.xlu1 %1622 }
 0x3bb   : > { %v1625_v30 = vsub.f32 %v1617_v14, %v1623_v29  ;;  %v1620_v32 = vpop.xlane.xlu0 %1619 }
 0x3bc   : > { %v1624_v33 = vsub.f32 %v1616_v15, %v1620_v32 }
 0x3bd   : > { %v1628_v34 = vmul.f32 1.442695, %v1625_v30 }
 0x3be   : > { %v1626_v35 = vmul.f32 1.442695, %v1624_v33 }
 0x3bf   : > { %5471 = vpow2.f32 %v1628_v34 }
 0x3c0   : > { %5473 = vpow2.f32 %v1626_v35 }
 0x3c9   : > { %v5472_v36 = vpop.eup %5471 }
 0x3ca   : > { %v5474_v38 = vpop.eup %5473  ;;  %v1633_v39 = vsel %vm1419_vm5, %v5472_v36, 0.0 }
 0x3cb   : > { %1634 = vadd.xlane.f32.xlu1 %v1633_v39  ;;  %v1630_v40 = vsel %vm1419_vm5, %v5474_v38, 0.0 }
 0x3cc   : > { %1631 = vadd.xlane.f32.xlu0 %v1630_v40 }
 0x3dc   : > { %5448 = vrot.lane.b32.xlu1 %v5856_v51, %s5585_s0 }
 0x3e0   : > { %1729 = vrot.lane.b32.xlu1 %v5841_v41, %s5585_s0 }
 0x3e1   : > { %v1437_v42 = vpop.xlane.xlu1 %1436 }
 0x3e2   : > { %5475 = vrcp.f32 %v1437_v42  ;;  %5443 = vrot.lane.b32.xlu0 %v5847_v44, %s5583_s1  ;;  %v1434_v43 = vpop.xlane.xlu0 %1433  ;;  %s6274_s1 = sld [smem:[#allocation12_spill]] }
 0x3e3   : > { %5477 = vrcp.f32 %v1434_v43 }
 0x3e6   : > { %1731 = vrot.lane.b32.xlu0 %v5839_v37, %s5585_s0 }
 0x3ec   : > { %v5476_v45 = vpop.eup %5475 }
 0x3ed   : > { %v5478_v46 = vpop.eup %5477  ;;  %v1441_v48 = vmul.f32 %v5476_v45, %v5468_v24 }
 0x3ee   : > { %v1440_v47 = vmul.f32 %v5478_v46, %v5470_v25 }
 0x3f0   : > { %4944 = vmatprep.mubr.msk.f32.mxu0 %vm1419_vm5, %v1440_v47 }
 0x3f1   : > { %4945 = vmatmul.mubr.msk.f32.vlgmr.msra.gmra.mrb[2].mxu0 %vm1419_vm5, %v1441_v48 }
 0x458   : > { %v1635_v49 = vpop.xlane.xlu1 %1634 }
 0x459   : > { %5479 = vrcp.f32 %v1635_v49  ;;  %v1632_v52 = vpop.xlane.xlu0 %1631 }
 0x45a   : > { %5481 = vrcp.f32 %v1632_v52 }
 0x45c   : > { %v5449_v53 = vpop.permute.xlu1 %5448 }
 0x45d   : > { %v5444_v54 = vpop.permute.xlu0 %5443  ;;  %v5451_v55 = vunpack.i.h.bf16 %v5449_v53  ;;  %v5450_v56 = vunpack.i.l.bf16 %v5449_v53 }
 0x45e   : > { %v5446_v57 = vunpack.i.h.bf16 %v5444_v54  ;;  %v5445_v58 = vunpack.i.l.bf16 %v5444_v54 }
 0x45f   : > { %v5105_v61 = vpack.c.bf16 %v5451_v55, %v5450_v56 }
 0x460   : > { %v5101_v59 = vpack.c.bf16 %v5446_v57, %v5445_v58  ;;  %v1730_v5 = vpop.permute.xlu1 %1729 }
 0x461   : > { %v1732_v6 = vpop.permute.xlu0 %1731 }
 0x462   : > { %5102 = vmatprep.subr.bf16.mxu0 %v5101_v59 }
 0x463   : > { %v5480_v62 = vpop.eup %5479  ;;  %5104 = vmatpush3.bf16.msra.mxu0 %v5101_v59 }
 0x464   : > { %v5482_v63 = vpop.eup %5481  ;;  %5107 = vmatprep.subr.msk.bf16.mxu0 %vm5852_vm2, %v5105_v61  ;;  %v1639_v3 = vmul.f32 %v5480_v62, %v5472_v36 }
 0x465   : > { %v1638_v2 = vmul.f32 %v5482_v63, %v5474_v38 }
 0x467   : > { %4958 = vmatprep.mubr.msk.f32.mxu0 %vm1419_vm5, %v1638_v2 }
 0x468   : > { %4959 = vmatmul.mubr.msk.f32.vlgmr.msra.gmra.mrb[4].mxu0 %vm1419_vm5, %v1639_v3 }
 0x469   : > { %4965 = vmatprep.mubr.msk.f32.mxu0 %vm1327_vm1, %v1730_v5 }
 0x46c   : > { %5110 = vmatpush3.bf16.xpose.msk.msra.mxu0 %vm5852_vm2, %v5105_v61 }
 0x473   : > { %4966 = vmatmul.mubr.msk.f32.vlgmr.msra.gmra.mrb[6].mxu0 %vm1327_vm1, %v1732_v6 }
 0x4c4   : > { %v5914_v7 = vpop.f32.mrb[2].mxu0 }
 0x4c5   : > { %v5916_v8 = vpop.f32.mrb[3].mxu0 }
 0x53b   : > { %v5918_v9 = vpop.f32.mrb[4].mxu0 }
 0x53c   : > { %v5920_v10 = vpop.f32.mrb[5].mxu0 }
 0x546   : > { %v4967_v11 = vpop.f32.mrb[6].mxu0 }
 0x547   : > { %v1821_v12 = vmul.f32 0.35355338, %v4967_v11  ;;  %v1811_v13 = vpop.f32.mrb[7].mxu0 }
 0x548   : > { %v1820_v14 = vmul.f32 0.35355338, %v1811_v13 }
 0x549   : > { %v1823_v15 = vadd.f32 %v1821_v12, %v5879_v1 }
 0x54a   : > { %v1822_v16 = vadd.f32 %v1820_v14, %v5882_v4 }
 0x54b   : > { %v1827_v17 = vsel %vm1419_vm5, %v1823_v15, -inf }
 0x54c   : > { %1828 = vmax.xlane.f32.xlu0 %v1827_v17  ;;  %v1824_v18 = vsel %vm1419_vm5, %v1822_v16, -inf  ;;  %v2168_v17 = vld [vmem:[%s5651_s19] sm:$0xff] }
 0x54d   : > { %1825 = vmax.xlane.f32.xlu1 %v1824_v18  ;;  %v2169_v18 = vld [vmem:[%s5651_s19 + $0x8] sm:$0xff] }
 0x5d9   : > { %v1829_v19 = vpop.xlane.xlu0 %1828 }
 0x5da   : > { %v1831_v20 = vsub.f32 %v1823_v15, %v1829_v19  ;;  %v1826_v21 = vpop.xlane.xlu1 %1825  ;;  %v2170_v19 = vld [vmem:[%s5651_s19 + $0x10] sm:$0xff] }
 0x5db   : > { %v1830_v22 = vsub.f32 %v1822_v16, %v1826_v21  ;;  %v2171_v21 = vld [vmem:[%s5651_s19 + $0x18] sm:$0xff] }
 0x5dc   : > { %v1834_v23 = vmul.f32 1.442695, %v1831_v20  ;;  %v5125_v20 = vpack.c.bf16 %v2169_v18, %v2168_v17  ;;  %v2434_v17 = vld [vmem:[%s6268_s11 + $0xa0] sm:$0xff]  ;;  %v2435_v18 = vld [vmem:[%s6268_s11 + $0xa8] sm:$0xff] }
 0x5dd   : > { %v1832_v24 = vmul.f32 1.442695, %v1830_v22  ;;  %v5129_v22 = vpack.c.bf16 %v2171_v21, %v2170_v19  ;;  %v2418_v21 = vld [vmem:[%s6268_s11 + $0x20] sm:$0xff] }
 0x5de   : > { %5483 = vpow2.f32 %v1834_v23 }
 0x5df   : > { %5485 = vpow2.f32 %v1832_v24 }
 0x5e8   : > { %v5484_v25 = vpop.eup %5483 }
 0x5e9   : > { %v5486_v27 = vpop.eup %5485  ;;  %v1839_v28 = vsel %vm1419_vm5, %v5484_v25, 0.0 }
 0x5ea   : > { %1840 = vadd.xlane.f32.xlu1 %v1839_v28  ;;  %v1836_v29 = vsel %vm1419_vm5, %v5486_v27, 0.0 }
 0x5eb   : > { %1837 = vadd.xlane.f32.xlu0 %v1836_v29 }
 0x5fb   : > { %5458 = vrot.lane.b32.xlu1 %v5856_v51, %s5586_s20 }
 0x5ff   : > { %1933 = vrot.lane.b32.xlu1 %v5841_v41, %s5586_s20 }
 0x601   : > { %5453 = vrot.lane.b32.xlu0 %v5847_v44, %s5585_s0  ;;  %s6275_s0 = sld [smem:[#allocation14_spill]] }
 0x605   : > { %1935 = vrot.lane.b32.xlu0 %v5839_v37, %s5586_s20 }
 0x677   : > { %v1841_v30 = vpop.xlane.xlu1 %1840 }
 0x678   : > { %5487 = vrcp.f32 %v1841_v30  ;;  %v1838_v32 = vpop.xlane.xlu0 %1837 }
 0x679   : > { %5489 = vrcp.f32 %v1838_v32 }
 0x67b   : > { %v5459_v33 = vpop.permute.xlu1 %5458 }
 0x67c   : > { %v5454_v34 = vpop.permute.xlu0 %5453  ;;  %v5461_v35 = vunpack.i.h.bf16 %v5459_v33  ;;  %v5460_v36 = vunpack.i.l.bf16 %v5459_v33 }
 0x67d   : > { %v5456_v38 = vunpack.i.h.bf16 %v5454_v34  ;;  %v5455_v39 = vunpack.i.l.bf16 %v5454_v34 }
 0x67e   : > { %v5115_v40 = vpack.c.bf16 %v5461_v35, %v5460_v36 }
 0x67f   : > { %v5111_v51 = vpack.c.bf16 %v5456_v38, %v5455_v39  ;;  %v1934_v45 = vpop.permute.xlu1 %1933 }
 0x680   : > { %v1936_v46 = vpop.permute.xlu0 %1935 }
 0x681   : > { %5112 = vmatprep.subr.bf16.mxu1 %v5111_v51 }
 0x682   : > { %v5488_v41 = vpop.eup %5487  ;;  %5114 = vmatpush3.bf16.msra.mxu1 %v5111_v51  ;;  %v4711_v51 = vld [vmem:[%s5656_s24] ss:$0 sm:$0xff] }
 0x683   : > { %v5490_v42 = vpop.eup %5489  ;;  %5117 = vmatprep.subr.msk.bf16.mxu1 %vm5852_vm2, %v5115_v40  ;;  %v1845_v43 = vmul.f32 %v5488_v41, %v5484_v25 }
 0x684   : > { %v1844_v37 = vmul.f32 %v5490_v42, %v5486_v27 }
 0x686   : > { %4972 = vmatprep.mubr.msk.f32.mxu1 %vm1419_vm5, %v1844_v37 }
 0x687   : > { %4973 = vmatmul.mubr.msk.f32.vlgmr.msra.gmra.mrb[8].mxu1 %vm1419_vm5, %v1845_v43 }
 0x688   : > { %4979 = vmatprep.mubr.msk.f32.mxu1 %vm1327_vm1, %v1934_v45 }
 0x68b   : > { %5120 = vmatpush3.bf16.xpose.msk.msra.mxu1 %vm5852_vm2, %v5115_v40 }
 0x692   : > { %4980 = vmatmul.mubr.msk.f32.vlgmr.msra.gmra.mrb[10].mxu1 %vm1327_vm1, %v1936_v46 }
 0x693   : > { %2397 = vmatprep.mubr.f32.mxu1 %v5584_v0 }
 0x75a   : > { %v4974_v47 = vpop.f32.mrb[8].mxu1 }
 0x75b   : > { %v1924_v48 = vpop.f32.mrb[9].mxu1 }
 0x765   : > { %v4981_v49 = vpop.f32.mrb[10].mxu1 }
 0x766   : > { %v2025_v52 = vmul.f32 0.35355338, %v4981_v49  ;;  %v2015_v53 = vpop.f32.mrb[11].mxu1 }
 0x767   : > { %v2024_v54 = vmul.f32 0.35355338, %v2015_v53 }
 0x768   : > { %v2027_v55 = vadd.f32 %v2025_v52, %v5879_v1 }
 0x769   : > { %v2026_v56 = vadd.f32 %v2024_v54, %v5882_v4 }
 0x76a   : > { %v2031_v57 = vsel %vm1419_vm5, %v2027_v55, -inf }
 0x76b   : > { %2032 = vmax.xlane.f32.xlu0 %v2031_v57  ;;  %v2028_v50 = vsel %vm1419_vm5, %v2026_v56, -inf  ;;  %v2310_v57 = vld [vmem:[%s5671_s12 + $0x18] sm:$0xff] }
 0x76c   : > { %2029 = vmax.xlane.f32.xlu1 %v2028_v50 }
 0x7f8   : > { %v2033_v58 = vpop.xlane.xlu0 %2032 }
 0x7f9   : > { %v2035_v59 = vsub.f32 %v2027_v55, %v2033_v58  ;;  %v2030_v61 = vpop.xlane.xlu1 %2029  ;;  %v2307_v58 = vld [vmem:[%s5671_s12] sm:$0xff] }
 0x7fa   : > { %v2034_v62 = vsub.f32 %v2026_v56, %v2030_v61  ;;  %v2308_v56 = vld [vmem:[%s5671_s12 + $0x8] sm:$0xff] }
 0x7fb   : > { %v2038_v63 = vmul.f32 1.442695, %v2035_v59  ;;  %v5133_v50 = vpack.c.bf16 %v2310_v57, %v2308_v56  ;;  %v2309_v59 = vld [vmem:[%s5671_s12 + $0x10] sm:$0xff]  ;;  %v4715_v56 = vld [vmem:[%s6270_s16] ss:$0 sm:$0xff]  ;;  %s6281_s16 = sld [smem:[#allocation20_spill]] }
 0x7fc   : > { %v2036_v2 = vmul.f32 1.442695, %v2034_v62  ;;  %v5135_v61 = vpack.c.bf16 %v2309_v59, %v2307_v58  ;;  %v2312_v62 = vld [vmem:[%s5671_s12 + $0x28] sm:$0xff] }
 0x7fd   : > { %5491 = vpow2.f32 %v2038_v63  ;;  %5134 = vmatprep.subr.bf16.mxu1 %v5133_v50  ;;  %v2314_v63 = vld [vmem:[%s5671_s12 + $0x38] sm:$0xff] }
 0x7fe   : > { %5493 = vpow2.f32 %v2036_v2  ;;  %5136 = vmatpush1.bf16.msra.mxu1 %v5135_v61  ;;  %v5137_v2 = vpack.c.bf16 %v2314_v63, %v2312_v62  ;;  %v2427_v63 = vld [vmem:[%s6268_s11 + $0x68] sm:$0xff] }
 0x800   : > { %5138 = vmatprep.subr.bf16.mxu1 %v5137_v2 }
 0x807   : > { %v5492_v3 = vpop.eup %5491 }
 0x808   : > { %v5494_v5 = vpop.eup %5493  ;;  %v2043_v1 = vsel %vm1419_vm5, %v5492_v3, 0.0 }
 0x809   : > { %2044 = vadd.xlane.f32.xlu1 %v2043_v1  ;;  %v2040_v4 = vsel %vm1419_vm5, %v5494_v5, 0.0 }
 0x80a   : > { %2041 = vadd.xlane.f32.xlu0 %v2040_v4  ;;  %v2430_v4 = vld [vmem:[%s6268_s11 + $0x80] sm:$0xff] }
 0x81a   : > { %2139 = vrot.lane.b32.xlu1 %v5920_v10, %s5587_s2 }
 0x81e   : > { %2141 = vrot.lane.b32.xlu1 %v5918_v9, %s5587_s2  ;;  %s6277_s2 = sld [smem:[#allocation13_spill]] }
 0x820   : > { %5463 = vrot.lane.b32.xlu0 %v5847_v44, %s5586_s20  ;;  %s6276_s20 = sld [smem:[#allocation16_spill]] }
 0x822   : > { %2149 = vrot.lane.b32.xlu1 %v4974_v47, %s5588_s7 }
 0x824   : > { %2147 = vrot.lane.b32.xlu0 %v1924_v48, %s5588_s7  ;;  %s6278_s7 = sld [smem:[#allocation18_spill]] }
 0x896   : > { %v2045_v6 = vpop.xlane.xlu1 %2044 }
 0x897   : > { %5495 = vrcp.f32 %v2045_v6  ;;  %v2042_v11 = vpop.xlane.xlu0 %2041  ;;  %v2431_v6 = vld [vmem:[%s6268_s11 + $0x88] sm:$0xff] }
 0x898   : > { %5497 = vrcp.f32 %v2042_v11  ;;  %v2414_v11 = vld [vmem:[%s6268_s11] sm:$0xff] }
 0x89a   : > { %v2140_v25 = vpop.permute.xlu1 %2139 }
 0x89b   : > { %v5464_v12 = vpop.permute.xlu0 %5463  ;;  %v2161_v30 = vsel %vm1327_vm1, %v5916_v8, %v2140_v25 }
 0x89c   : > { %v5466_v13 = vunpack.i.h.bf16 %v5464_v12  ;;  %v5465_v14 = vunpack.i.l.bf16 %v5464_v12  ;;  %v5141_v12 = vpack.c.bf16 %v2431_v6, %v2430_v4  ;;  %v2428_v4 = vld [vmem:[%s6268_s11 + $0x70] sm:$0xff] }
 0x89e   : > { %v5121_v10 = vpack.c.bf16 %v5466_v13, %v5465_v14  ;;  %v2142_v27 = vpop.permute.xlu1 %2141  ;;  %v2415_v13 = vld [vmem:[%s6268_s11 + $0x8] sm:$0xff]  ;;  %v2432_v14 = vld [vmem:[%s6268_s11 + $0x90] sm:$0xff] }
 0x89f   : > { %v2148_v29 = vpop.permute.xlu0 %2147  ;;  %v2162_v33 = vsel %vm1327_vm1, %v5914_v7, %v2142_v27 }
 0x8a0   : > { %5122 = vmatprep.subr.bf16.mxu0 %v5121_v10  ;;  %v2163_v34 = vsel %vm1419_vm5, %v2161_v30, %v2148_v29  ;;  %v2421_v29 = vld [vmem:[%s6268_s11 + $0x38] sm:$0xff]  ;;  %v2438_v30 = vld [vmem:[%s6268_s11 + $0xc0] sm:$0xff] }
 0x8a1   : > { %v5496_v9 = vpop.eup %5495  ;;  %5124 = vmatpush3.bf16.msra.mxu0 %v5121_v10  ;;  %v2433_v10 = vld [vmem:[%s6268_s11 + $0x98] sm:$0xff] }
 0x8a2   : > { %v5498_v15 = vpop.eup %5497  ;;  %v2049_v16 = vmul.f32 %v5496_v9, %v5492_v3  ;;  %5126 = vmatprep.subr.bf16.mxu0 %v5125_v20  ;;  %v2150_v28 = vpop.permute.xlu1 %2149  ;;  %v2311_v3 = vld [vmem:[%s5671_s12 + $0x20] sm:$0xff]  ;;  %v5143_v9 = vpack.c.bf16 %v2415_v13, %v2414_v11  ;;  %v2319_v11 = vsub.s32 0, %v5874_v60  ;;  %v2323_v13 = vsub.s32 1, %v5874_v60 }
 0x8a3   : > { %v2048_v44 = vmul.f32 %v5498_v15, %v5494_v5  ;;  %v2164_v36 = vsel %vm1419_vm5, %v2162_v33, %v2150_v28  ;;  %v2313_v5 = vld [vmem:[%s5671_s12 + $0x30] sm:$0xff]  ;;  %v5145_v15 = vpack.c.bf16 %v2433_v10, %v2432_v14 }
 0x8a4   : > { %v5139_v1 = vpack.c.bf16 %v2313_v5, %v2311_v3  ;;  %v2420_v28 = vld [vmem:[%s6268_s11 + $0x30] sm:$0xff]  ;;  %v2445_v5 = vld [vmem:[%s6268_s11 + $0xf8] sm:$0xff] }
 0x8a5   : > { %4986 = vmatprep.mubr.msk.f32.mxu0 %vm1419_vm5, %v2048_v44  ;;  %v2416_v44 = vld [vmem:[%s6268_s11 + $0x10] sm:$0xff]  ;;  %v5155_v33 = vpack.c.bf16 %v2421_v29, %v2420_v28 }
 0x8a6   : > { %4987 = vmatmul.mubr.msk.f32.vlgmr.msra.gmra.mrb[8].mxu0 %vm1419_vm5, %v2049_v16  ;;  %5140 = vmatpush1.bf16.msra.mxu1 %v5139_v1  ;;  %v2417_v16 = vld [vmem:[%s6268_s11 + $0x18] sm:$0xff]  ;;  %v2444_v3 = vld [vmem:[%s6268_s11 + $0xf0] sm:$0xff] }
 0x8a7   : > { %5128 = vmatpush3.bf16.msra.mxu0 %v5125_v20  ;;  %v5147_v19 = vpack.c.bf16 %v2417_v16, %v2416_v44  ;;  %v5149_v20 = vpack.c.bf16 %v2435_v18, %v2434_v17  ;;  %v5169_v1 = vpack.c.bf16 %v2445_v5, %v2444_v3  ;;  %v2581_v3 = vld [vmem:[#allocation3 + $0x30] sm:$0xff] }
 0x8a8   : > { %5130 = vmatprep.subr.bf16.mxu0 %v5129_v22 }
 0x8ab   : > { %5132 = vmatpush3.bf16.msra.mxu0 %v5129_v22  ;;  %v2419_v22 = vld [vmem:[%s6268_s11 + $0x28] sm:$0xff] }
 0x8ac   : > { %5142 = vmatprep.subr.bf16.mxu0 %v5141_v12  ;;  %v5151_v25 = vpack.c.bf16 %v2419_v22, %v2418_v21  ;;  %v2315_v12 = vld [vmem:[%s6271_s23] sm:$0x3]  ;;  %s6282_s23 = sld [smem:[#allocation19_spill]] }
 0x8ad   : > { %v2320_v14 = vrot.slane %v2315_v12, %v2319_v11  ;;  %v2324_v10 = vrot.slane %v2315_v12, %v2323_v13  ;;  %v2985_v12 = vld [vmem:[#allocation3 + $0x130] sm:$0xff] }
 0x979   : > { %v4988_v23 = vpop.f32.mrb[8].mxu0 }
 0x97a   : > { %2157 = vrot.lane.b32.xlu1 %v4988_v23, %s5589_s10  ;;  %v2128_v24 = vpop.f32.mrb[9].mxu0  ;;  %v2436_v23 = vld [vmem:[%s6268_s11 + $0xb0] sm:$0xff] }
 0x97b   : > { %2155 = vrot.lane.b32.xlu0 %v2128_v24, %s5589_s10  ;;  %v2437_v24 = vld [vmem:[%s6268_s11 + $0xb8] sm:$0xff]  ;;  %s6279_s10 = sld [smem:[#allocation15_spill]] }
 0x97c   : > { %v5153_v27 = vpack.c.bf16 %v2437_v24, %v2436_v23 }
 0x9ec   : > { %v2158_v32 = vpop.permute.xlu1 %2157 }
 0x9ed   : > { %v2156_v35 = vpop.permute.xlu0 %2155  ;;  %v2167_v39 = vsel %vm2165_vm6, %v2164_v36, %v2158_v32  ;;  %v2439_v32 = vld [vmem:[%s6268_s11 + $0xc8] sm:$0xff] }
 0x9ee   : > { %v2166_v38 = vsel %vm2165_vm6, %v2163_v34, %v2156_v35  ;;  %v5157_v34 = vpack.c.bf16 %v2439_v32, %v2438_v30  ;;  %v2422_v35 = vld [vmem:[%s6268_s11 + $0x40] sm:$0xff]  ;;  %v2423_v36 = vld [vmem:[%s6268_s11 + $0x48] sm:$0xff] }
 0x9ef   : > { %4997 = vmatprep.mubr.msk.f32.mxu0 %vm1064_vm0, %v2166_v38  ;;  %v2440_v38 = vld [vmem:[%s6268_s11 + $0xd0] sm:$0xff] }
 0x9f0   : > { %4998 = vmatmul.mubr.msk.f32.vlgmr.msra.gmra.mrb[10].mxu0 %vm1064_vm0, %v2167_v39  ;;  %v2441_v39 = vld [vmem:[%s6268_s11 + $0xd8] sm:$0xff] }
 0x9f1   : > { %5144 = vmatpush3.bf16.msra.mxu0 %v5143_v9 }
 0x9f2   : > { %5146 = vmatprep.subr.bf16.mxu0 %v5145_v15 }
 0x9f5   : > { %5148 = vmatpush3.bf16.msra.mxu0 %v5147_v19 }
 0x9f6   : > { %5150 = vmatprep.subr.bf16.mxu0 %v5149_v20 }
 0x9f9   : > { %5152 = vmatpush3.bf16.msra.mxu0 %v5151_v25 }
 0x9fa   : > { %5154 = vmatprep.subr.bf16.mxu0 %v5153_v27  ;;  %v4718_v27 = vld [vmem:[%s6272_s22] ss:$0 sm:$0xff]  ;;  %s1013_s22 = scalar_lea.vmem %s5759_s27, %s5800_s18 }
 0x9fd   : > { %5156 = vmatpush3.bf16.msra.mxu0 %v5155_v33 }
 0x9fe   : > { %5158 = vmatprep.subr.bf16.mxu0 %v5157_v34 }
 0xac3   : > { %v4999_v40 = vpop.f32.mrb[10].mxu0 }
 0xac4   : > { %v2257_v41 = vadd.f32 %v4999_v40, %v4711_v51  ;;  %v2251_v42 = vpop.f32.mrb[11].mxu0  ;;  %v5161_v40 = vpack.c.bf16 %v2441_v39, %v2440_v38 }
 0xac5   : > { %v2252_v8 = vadd.f32 %v4711_v51, %v2251_v42  ;;  %v5159_v51 = vpack.c.bf16 %v2423_v36, %v2422_v35  ;;  %v2425_v42 = vld [vmem:[%s6268_s11 + $0x58] sm:$0xff] }
 0xac6   : > { %v2261_v37 = vadd.f32 %v2257_v41, %v5827_v31  ;;  %v2424_v41 = vld [vmem:[%s6268_s11 + $0x50] sm:$0xff] }
 0xac7   : > { %v2260_v7 = vadd.f32 %v2252_v8, %v5819_v26  ;;  %v2442_v8 = vld [vmem:[%s6268_s11 + $0xe0] sm:$0xff]  ;;  %5160 = vmatpush3.bf16.msra.mxu0 %v5159_v51 }
 0xac8   : > { %v2267_v43 = vsel %vm1064_vm0, %v2261_v37, 0.0  ;;  %5162 = vmatprep.subr.bf16.mxu0 %v5161_v40 }
 0xac9   : > { %2268 = vadd.xlane.f32.xlu1 %v2267_v43  ;;  %v2264_v45 = vsel %vm1064_vm0, %v2260_v7, 0.0 }
 0xaca   : > { %2265 = vadd.xlane.f32.xlu0 %v2264_v45 }
 0xb56   : > { %v2269_v46 = vpop.xlane.xlu1 %2268 }
 0xb57   : > { %v2272_v47 = vmul.f32 0.03125, %v2269_v46  ;;  %v2266_v48 = vpop.xlane.xlu0 %2265 }
 0xb58   : > { %v2271_v49 = vmul.f32 0.03125, %v2266_v48 }
 0xb59   : > { %v5974_v52 = vsub.f32 %v2261_v37, %v2272_v47  ;;  %v2443_v37 = vld [vmem:[%s6268_s11 + $0xe8] sm:$0xff] }
 0xb5a   : > { %v5976_v31 = vsub.f32 %v2260_v7, %v2271_v49  ;;  %v5163_v7 = vpack.c.bf16 %v2425_v42, %v2424_v41  ;;  %v5165_v43 = vpack.c.bf16 %v2443_v37, %v2442_v8 }
 0xb5b   : > { %v2276_v54 = vmul.f32 %v5974_v52, %v5974_v52 }
 0xb5c   : > { %v2275_v26 = vmul.f32 %v5976_v31, %v5976_v31  ;;  %5164 = vmatpush3.bf16.msra.mxu0 %v5163_v7 }
 0xb5d   : > { %v2280_v55 = vsel %vm1064_vm0, %v2276_v54, 0.0  ;;  %5166 = vmatprep.subr.bf16.mxu0 %v5165_v43  ;;  %v4714_v54 = vld [vmem:[%s6269_s15] ss:$0 sm:$0xff]  ;;  %s6280_s15 = sld [smem:[#allocation17_spill]] }
 0xb5e   : > { %v2277_v53 = vsel %vm1064_vm0, %v2275_v26, 0.0 }
 0xb5f   : > { %2278 = vadd.xlane.f32.xlu0 %v2277_v53 }
 0xb63   : > { %2281 = vadd.xlane.f32.xlu0 %v2280_v55 }
 0xbec   : > { %v2279_v45 = vpop.xlane.xlu0 %2278 }
 0xbed   : > { %v2283_v46 = vmul.f32 0.03125, %v2279_v45 }
 0xbef   : > { %v2285_v47 = vadd.f32 1e-05, %v2283_v46 }
 0xbf0   : > { %v2282_v48 = vpop.xlane.xlu0 %2281 }
 0xbf1   : > { %5499 = vrsqrt.f32 %v2285_v47  ;;  %v2284_v49 = vmul.f32 0.03125, %v2282_v48  ;;  %v2576_v48 = vld [vmem:[#allocation3 + $0x8] sm:$0xff] }
 0xbf3   : > { %v2286_v26 = vadd.f32 1e-05, %v2284_v49  ;;  %v2578_v49 = vld [vmem:[#allocation3 + $0x18] sm:$0xff] }
 0xbf5   : > { %5501 = vrsqrt.f32 %v2286_v26  ;;  %v5173_v26 = vpack.c.bf16 %v2578_v49, %v2576_v48  ;;  %v3185_v48 = vld [vmem:[#allocation3 + $0x1a0] sm:$0xff]  ;;  %v3187_v49 = vld [vmem:[#allocation3 + $0x1b0] sm:$0xff] }
 0xbf7   : > { %5174 = vmatprep.subr.bf16.mxu1 %v5173_v26 }
 0xbfb   : > { %v5500_v53 = vpop.eup %5499 }
 0xbfc   : > { %v2289_v55 = vmul.f32 %v5500_v53, %v5976_v31  ;;  %v2426_v31 = vld [vmem:[%s6268_s11 + $0x60] sm:$0xff] }
 0xbfd   : > { %v5167_v2 = vpack.c.bf16 %v2427_v63, %v2426_v31  ;;  %v2575_v53 = vld [vmem:[#allocation3] sm:$0xff]  ;;  %v2582_v31 = vld [vmem:[#allocation3 + $0x38] sm:$0xff] }
 0xbfe   : > { %v2297_v57 = vmul.f32 %v4714_v54, %v2289_v55 }
 0xbff   : > { %v5502_v50 = vpop.eup %5501  ;;  %5168 = vmatpush3.bf16.msra.mxu0 %v5167_v2  ;;  %v2579_v2 = vld [vmem:[#allocation3 + $0x20] sm:$0xff] }
 0xc00   : > { %v2305_v58 = vadd.f32 %v4715_v56, %v2297_v57  ;;  %v2290_v59 = vmul.f32 %v5502_v50, %v5974_v52  ;;  %v2429_v52 = vld [vmem:[%s6268_s11 + $0x78] sm:$0xff]  ;;  %5170 = vmatprep.subr.bf16.mxu0 %v5169_v1  ;;  %v5179_v5 = vpack.c.bf16 %v2581_v3, %v2579_v2  ;;  %v2984_v1 = vld [vmem:[#allocation3 + $0x128] sm:$0xff] }
 0xc01   : > { %v5171_v6 = vpack.c.bf16 %v2429_v52, %v2428_v4  ;;  %v2982_v57 = vld [vmem:[#allocation3 + $0x118] sm:$0xff]  ;;  %v3388_v3 = vld [vmem:[#allocation3 + $0x228] sm:$0xff] }
 0xc02   : > { %4716 = vmatmul.mubr.msk.f32.vlgmr.msra.gmra.mrb[12].mxu1 %vm1064_vm0, %v2305_v58  ;;  %v2298_v61 = vmul.f32 %v4714_v54, %v2290_v59  ;;  %v2577_v54 = vld [vmem:[#allocation3 + $0x10] sm:$0xff]  ;;  %v2986_v4 = vld [vmem:[#allocation3 + $0x138] sm:$0xff] }
 0xc03   : > { %2403 = vmatprep.mubr.f32.mxu1 %v5584_v0  ;;  %5172 = vmatpush3.bf16.msra.mxu0 %v5171_v6  ;;  %v5175_v55 = vpack.c.bf16 %v2577_v54, %v2575_v53  ;;  %v2981_v59 = vld [vmem:[#allocation3 + $0x110] sm:$0xff]  ;;  %v5209_v52 = vpack.c.bf16 %v2986_v4, %v2984_v1  ;;  %v2983_v6 = vld [vmem:[#allocation3 + $0x120] sm:$0xff]  ;;  %v3384_v53 = vld [vmem:[#allocation3 + $0x208] sm:$0xff] }
 0xc04   : > { %v2306_v62 = vadd.f32 %v4715_v56, %v2298_v61  ;;  %v2980_v56 = vld [vmem:[#allocation3 + $0x108] sm:$0xff]  ;;  %v3386_v54 = vld [vmem:[#allocation3 + $0x218] sm:$0xff] }
 0xc05   : > { %v5205_v50 = vpack.c.bf16 %v2982_v57, %v2980_v56  ;;  %5176 = vmatpush1.bf16.msra.mxu1 %v5175_v55  ;;  %v2777_v56 = vld [vmem:[#allocation3 + $0x80] sm:$0xff]  ;;  %v2779_v57 = vld [vmem:[#allocation3 + $0x90] sm:$0xff] }
 0xc06   : > { %4717 = vmatmul.mubr.msk.f32.gmra.mrb[14].mxu1 %vm1064_vm0, %v2306_v62  ;;  %v5191_v2 = vpack.c.bf16 %v2779_v57, %v2777_v56  ;;  %v3087_v56 = vld [vmem:[#allocation3 + $0x178] sm:$0xff] }
 0xc07   : > { %2650 = vmatprep.mubr.f32.mxu1 %v5584_v0  ;;  %5206 = vmatprep.subr.bf16.mxu0 %v5205_v50  ;;  %v5227_v50 = vpack.c.bf16 %v3187_v49, %v3185_v48  ;;  %v3788_v48 = vld [vmem:[#allocation3 + $0x308] sm:$0xff]  ;;  %v3790_v49 = vld [vmem:[#allocation3 + $0x318] sm:$0xff] }
 0xc08   : > { %v5269_v57 = vpack.c.bf16 %v3790_v49, %v3788_v48 }
 0xcd5   : > { %v2399_v9 = vpop.f32.mrb[12].mxu1 }
 0xcd6   : > { %v2400_v15 = vadd.f32 %v2399_v9, %v2320_v14  ;;  %v2401_v44 = vpop.f32.mrb[13].mxu1  ;;  %v2679_v9 = vld [vmem:[#allocation3 + $0x58] sm:$0xff] }
 0xcd7   : > { %v2402_v16 = vadd.f32 %v2401_v44, %v2324_v10  ;;  %v3182_v44 = vld [vmem:[#allocation3 + $0x188] sm:$0xff] }
 0xcd8   : > { %v2410_v19 = vmax.f32 %v2400_v15, 0.0 }
 0xcd9   : > { %v2411_v17 = vmax.f32 %v2402_v16, 0.0  ;;  %v2405_v18 = vpop.f32.mrb[14].mxu1  ;;  %v3184_v16 = vld [vmem:[#allocation3 + $0x198] sm:$0xff] }
 0xcda   : > { %v2406_v20 = vadd.f32 %v2405_v18, %v2320_v14  ;;  %v2407_v21 = vpop.f32.mrb[15].mxu1  ;;  %v5211_v14 = vpack.c.bf16 %v2985_v12, %v2983_v6  ;;  %v2783_v6 = vld [vmem:[#allocation3 + $0xb0] sm:$0xff] }
 0xcdb   : > { %v2408_v22 = vadd.f32 %v2407_v21, %v2324_v10  ;;  %2517 = vmatprep.mubr.f32.mxu0 %v2411_v17  ;;  %v2677_v10 = vld [vmem:[#allocation3 + $0x48] sm:$0xff]  ;;  %v5221_v17 = vpack.c.bf16 %v3184_v16, %v3182_v44  ;;  %v3387_v16 = vld [vmem:[#allocation3 + $0x220] sm:$0xff] }
 0xcdc   : > { %2518 = vmatmul.mubr.f32.vlgmr.msra.gmra.mrb[12].mxu0 %v2410_v19  ;;  %v2412_v24 = vmax.f32 %v2406_v20, 0.0  ;;  %v5181_v15 = vpack.c.bf16 %v2679_v9, %v2677_v10  ;;  %v2881_v10 = vld [vmem:[#allocation3 + $0xd8] sm:$0xff] }
 0xcdd   : > { %v2413_v23 = vmax.f32 %v2408_v22, 0.0 }
 0xcdf   : > { %2522 = vmatprep.mubr.f32.mxu0 %v2413_v23 }
 0xce0   : > { %2523 = vmatmul.mubr.f32.gmra.mrb[14].mxu0 %v2412_v24 }
 0xce1   : > { %3054 = vmatprep.mubr.f32.mxu0 %v5584_v0 }
 0xdaf   : > { %v4830_v25 = vpop.f32.mrb[12].mxu0 }
 0xdb0   : > { %v4831_v28 = vpop.f32.mrb[13].mxu0 }
 0xdb1   : > { %v4832_v29 = vadd.f32 %v4831_v28, %v4830_v25  ;;  %v6050_v25 = vld [vmem:[%s6273_s26] ss:$0 sm:$0xff]  ;;  %v2676_v28 = vld [vmem:[#allocation3 + $0x40] sm:$0xff] }
 0xdb3   : > { %v2520_v30 = vadd.f32 %v4832_v29, %v4718_v27  ;;  %v4833_v32 = vpop.f32.mrb[14].mxu0  ;;  %v2678_v29 = vld [vmem:[#allocation3 + $0x50] sm:$0xff] }
 0xdb4   : > { %v4834_v33 = vpop.f32.mrb[15].mxu0 }
 0xdb5   : > { %v4835_v34 = vadd.f32 %v4834_v33, %v4833_v32  ;;  %v2528_v35 = vadd.f32 %v2520_v30, %v2305_v58  ;;  %v2979_v58 = vld [vmem:[#allocation3 + $0x100] sm:$0xff]  ;;  %v6053_v30 = vld [vmem:[%s6274_s1] ss:$0 sm:$0xff]  ;;  %v2681_v32 = vld [vmem:[#allocation3 + $0x68] sm:$0xff] }
 0xdb6   : > { %v5207_v61 = vpack.c.bf16 %v2981_v59, %v2979_v58  ;;  %v2683_v33 = vld [vmem:[#allocation3 + $0x78] sm:$0xff]  ;;  %v2782_v58 = vld [vmem:[#allocation3 + $0xa8] sm:$0xff] }
 0xdb7   : > { %v2525_v36 = vadd.f32 %v4835_v34, %v4718_v27  ;;  %v2532_v38 = vsel %vm1064_vm0, %v2528_v35, 0.0  ;;  %v2784_v59 = vld [vmem:[#allocation3 + $0xb8] sm:$0xff] }
 0xdb8   : > { %2533 = vadd.xlane.f32.xlu1 %v2532_v38  ;;  %5208 = vmatpush1.bf16.msra.mxu0 %v5207_v61  ;;  %v5183_v38 = vpack.c.bf16 %v2678_v29, %v2676_v28  ;;  %v5237_v61 = vpack.c.bf16 %v3386_v54, %v3384_v53  ;;  %v5193_v4 = vpack.c.bf16 %v2784_v59, %v2782_v58  ;;  %v3080_v53 = vld [vmem:[#allocation3 + $0x140] sm:$0xff]  ;;  %v3789_v58 = vld [vmem:[#allocation3 + $0x310] sm:$0xff] }
 0xdb9   : > { %v2529_v39 = vadd.f32 %v2525_v36, %v2306_v62  ;;  %v2580_v62 = vld [vmem:[#allocation3 + $0x28] sm:$0xff]  ;;  %5210 = vmatprep.subr.bf16.mxu0 %v5209_v52  ;;  %v3183_v36 = vld [vmem:[#allocation3 + $0x190] sm:$0xff]  ;;  %v2781_v52 = vld [vmem:[#allocation3 + $0xa0] sm:$0xff] }
 0xdba   : > { %v5177_v63 = vpack.c.bf16 %v2582_v31, %v2580_v62  ;;  %v3383_v62 = vld [vmem:[#allocation3 + $0x200] sm:$0xff]  ;;  %v3385_v31 = vld [vmem:[#allocation3 + $0x210] sm:$0xff] }
 0xdbb   : > { %v2535_v51 = vsel %vm1064_vm0, %v2529_v39, 0.0  ;;  %v5239_v12 = vpack.c.bf16 %v3385_v31, %v3383_v62  ;;  %v3794_v62 = vld [vmem:[#allocation3 + $0x338] sm:$0xff] }
 0xdbc   : > { %2536 = vadd.xlane.f32.xlu0 %v2535_v51  ;;  %5178 = vmatprep.subr.bf16.mxu1 %v5177_v63  ;;  %v3188_v51 = vld [vmem:[#allocation3 + $0x1b8] sm:$0xff] }
 0xdbd   : > { %5180 = vmatpush1.bf16.msra.mxu1 %v5179_v5  ;;  %5212 = vmatpush1.bf16.msra.mxu0 %v5211_v14  ;;  %v3390_v5 = vld [vmem:[#allocation3 + $0x238] sm:$0xff]  ;;  %v2879_v14 = vld [vmem:[#allocation3 + $0xc8] sm:$0xff] }
 0xdbe   : > { %5182 = vmatprep.subr.bf16.mxu1 %v5181_v15  ;;  %5222 = vmatprep.subr.bf16.mxu0 %v5221_v17  ;;  %v5241_v44 = vpack.c.bf16 %v3390_v5, %v3388_v3  ;;  %v3389_v17 = vld [vmem:[#allocation3 + $0x230] sm:$0xff] }
 0xdbf   : > { %v3086_v3 = vld [vmem:[#allocation3 + $0x170] sm:$0xff] }
 0xe45   : > { %v2534_v40 = vpop.xlane.xlu1 %2533 }
 0xe46   : > { %v2538_v41 = vmul.f32 0.03125, %v2534_v40 }
 0xe48   : > { %v2540_v42 = vsub.f32 %v2528_v35, %v2538_v41  ;;  %v3181_v35 = vld [vmem:[#allocation3 + $0x180] sm:$0xff]  ;;  %v5185_v41 = vpack.c.bf16 %v2683_v33, %v2681_v32  ;;  %v3587_v33 = vld [vmem:[#allocation3 + $0x290] sm:$0xff] }
 0xe49   : > { %v2537_v8 = vpop.xlane.xlu0 %2536  ;;  %v3585_v32 = vld [vmem:[#allocation3 + $0x280] sm:$0xff] }
 0xe4a   : > { %v2539_v37 = vmul.f32 0.03125, %v2537_v8  ;;  %v2542_v7 = vmul.f32 %v2540_v42, %v2540_v42  ;;  %v2680_v8 = vld [vmem:[#allocation3 + $0x60] sm:$0xff] }
 0xe4c   : > { %v6043_v43 = vsub.f32 %v2529_v39, %v2539_v37  ;;  %v2544_v45 = vsel %vm1064_vm0, %v2542_v7, 0.0  ;;  %v3186_v39 = vld [vmem:[#allocation3 + $0x1a8] sm:$0xff]  ;;  %v5223_v37 = vpack.c.bf16 %v3183_v36, %v3181_v35  ;;  %v3592_v36 = vld [vmem:[#allocation3 + $0x2b8] sm:$0xff] }
 0xe4d   : > { %2545 = vadd.xlane.f32.xlu1 %v2544_v45  ;;  %v2778_v7 = vld [vmem:[#allocation3 + $0x88] sm:$0xff]  ;;  %v2780_v45 = vld [vmem:[#allocation3 + $0x98] sm:$0xff] }
 0xe4e   : > { %v2543_v46 = vmul.f32 %v6043_v43, %v6043_v43  ;;  %v5189_v55 = vpack.c.bf16 %v2780_v45, %v2778_v7  ;;  %v3590_v35 = vld [vmem:[#allocation3 + $0x2a8] sm:$0xff]  ;;  %v3589_v45 = vld [vmem:[#allocation3 + $0x2a0] sm:$0xff] }
 0xe4f   : > { %v5257_v7 = vpack.c.bf16 %v3592_v36, %v3590_v35  ;;  %v3485_v35 = vld [vmem:[#allocation3 + $0x248] sm:$0xff]  ;;  %v3487_v36 = vld [vmem:[#allocation3 + $0x258] sm:$0xff] }
 0xe50   : > { %v2547_v47 = vsel %vm1064_vm0, %v2543_v46, 0.0 }
 0xe51   : > { %2548 = vadd.xlane.f32.xlu0 %v2547_v47  ;;  %v5225_v47 = vpack.c.bf16 %v3188_v51, %v3186_v39  ;;  %v2882_v51 = vld [vmem:[#allocation3 + $0xe0] sm:$0xff] }
 0xeda   : > { %v2546_v18 = vpop.xlane.xlu1 %2545 }
 0xedb   : > { %v2550_v19 = vmul.f32 0.03125, %v2546_v18  ;;  %v5195_v18 = vpack.c.bf16 %v2783_v6, %v2781_v52 }
 0xedd   : > { %v2552_v20 = vadd.f32 1e-05, %v2550_v19  ;;  %v3586_v19 = vld [vmem:[#allocation3 + $0x288] sm:$0xff] }
 0xede   : > { %v2549_v21 = vpop.xlane.xlu0 %2548 }
 0xedf   : > { %5503 = vrsqrt.f32 %v2552_v20  ;;  %v2551_v22 = vmul.f32 0.03125, %v2549_v21  ;;  %v3588_v20 = vld [vmem:[#allocation3 + $0x298] sm:$0xff]  ;;  %v5197_v21 = vpack.c.bf16 %v2881_v10, %v2879_v14  ;;  %v3793_v14 = vld [vmem:[#allocation3 + $0x330] sm:$0xff] }
 0xee0   : > { %v5253_v29 = vpack.c.bf16 %v3588_v20, %v3586_v19  ;;  %v3287_v19 = vld [vmem:[#allocation3 + $0x1e8] sm:$0xff]  ;;  %v3289_v20 = vld [vmem:[#allocation3 + $0x1f8] sm:$0xff] }
 0xee1   : > { %v2553_v23 = vadd.f32 1e-05, %v2551_v22  ;;  %v2878_v22 = vld [vmem:[#allocation3 + $0xc0] sm:$0xff] }
 0xee3   : > { %5505 = vrsqrt.f32 %v2553_v23  ;;  %v5243_v23 = vpack.c.bf16 %v3389_v17, %v3387_v16  ;;  %v3282_v16 = vld [vmem:[#allocation3 + $0x1c0] sm:$0xff]  ;;  %v3284_v17 = vld [vmem:[#allocation3 + $0x1d0] sm:$0xff] }
 0xee9   : > { %v5504_v24 = vpop.eup %5503 }
 0xeea   : > { %v2556_v27 = vmul.f32 %v5504_v24, %v2540_v42  ;;  %v2682_v42 = vld [vmem:[#allocation3 + $0x70] sm:$0xff]  ;;  %v2883_v24 = vld [vmem:[#allocation3 + $0xe8] sm:$0xff] }
 0xeeb   : > { %v5187_v26 = vpack.c.bf16 %v2682_v42, %v2680_v8  ;;  %v5255_v8 = vpack.c.bf16 %v3587_v33, %v3585_v32  ;;  %v3081_v42 = vld [vmem:[#allocation3 + $0x148] sm:$0xff]  ;;  %v3286_v32 = vld [vmem:[#allocation3 + $0x1e0] sm:$0xff]  ;;  %v3288_v33 = vld [vmem:[#allocation3 + $0x1f0] sm:$0xff] }
 0xeec   : > { %v2564_v34 = vmul.f32 %v6050_v25, %v2556_v27  ;;  %v2885_v27 = vld [vmem:[#allocation3 + $0xf8] sm:$0xff] }
 0xeed   : > { %v5506_v63 = vpop.eup %5505  ;;  %v5201_v39 = vpack.c.bf16 %v2885_v27, %v2883_v24  ;;  %v3994_v24 = vld [vmem:[#allocation3 + $0x3a8] sm:$0xff]  ;;  %v3996_v27 = vld [vmem:[#allocation3 + $0x3b8] sm:$0xff] }
 0xeee   : > { %v6057_v40 = vadd.f32 %v6053_v30, %v2564_v34  ;;  %v2557_v9 = vmul.f32 %v5506_v63, %v6043_v43  ;;  %v2880_v43 = vld [vmem:[#allocation3 + $0xd0] sm:$0xff] }
 0xeef   : > { %v5199_v34 = vpack.c.bf16 %v2880_v43, %v2878_v22  ;;  %v3989_v22 = vld [vmem:[#allocation3 + $0x380] sm:$0xff]  ;;  %v3991_v43 = vld [vmem:[#allocation3 + $0x390] sm:$0xff] }
 0xef0   : > { %4721 = vmatmul.mubr.msk.f32.vlgmr.msra.gmra.mrb[16].mxu1 %vm1064_vm0, %v6057_v40  ;;  %v2987_v46 = vrot.slane %v6057_v40, 4  ;;  %v2684_v1 = vrot.slane %v6057_v40, 1  ;;  %v3189_v15 = vrot.slane %v6057_v40, 6  ;;  %v2565_v28 = vmul.f32 %v6050_v25, %v2557_v9  ;;  %v3990_v9 = vld [vmem:[#allocation3 + $0x388] sm:$0xff] }
 0xef1   : > { %5184 = vmatpush1.bf16.msra.mxu1 %v5183_v38  ;;  %2751 = vmatprep.mubr.f32.mxu1 %v5584_v0  ;;  %v2785_v38 = vrot.slane %v6057_v40, 2  ;;  %v2886_v31 = vrot.slane %v6057_v40, 3  ;;  %v3290_v49 = vrot.slane %v6057_v40, 7 }
 0xef2   : > { %4725 = vmatmul.mubr.msk.f32.vlgmr.msra.gmra.mrb[16].mxu0 %vm1064_vm0, %v2987_v46  ;;  %5186 = vmatprep.subr.bf16.mxu1 %v5185_v41  ;;  %v2884_v41 = vld [vmem:[#allocation3 + $0xf0] sm:$0xff]  ;;  %v6075_v25 = vadd.f32 %v6053_v30, %v2565_v28  ;;  %v3088_v28 = vrot.slane %v6057_v40, 5  ;;  %v3686_v40 = vld [vmem:[#allocation3 + $0x2c0] sm:$0xff] }
 0xef3   : > { %5224 = vmatpush1.bf16.msra.mxu0 %v5223_v37  ;;  %3256 = vmatprep.mubr.f32.mxu0 %v5584_v0  ;;  %v3083_v37 = vld [vmem:[#allocation3 + $0x158] sm:$0xff]  ;;  %v3591_v46 = vld [vmem:[#allocation3 + $0x2b0] sm:$0xff] }
 0xef4   : > { %5226 = vmatprep.subr.bf16.mxu0 %v5225_v47  ;;  %v5203_v47 = vpack.c.bf16 %v2884_v41, %v2882_v51  ;;  %v3082_v30 = vld [vmem:[#allocation3 + $0x150] sm:$0xff]  ;;  %v5259_v54 = vpack.c.bf16 %v3591_v46, %v3589_v45  ;;  %v3593_v52 = vrot.slane %v6075_v25, 2  ;;  %v3993_v51 = vld [vmem:[#allocation3 + $0x3a0] sm:$0xff]  ;;  %v3489_v46 = vld [vmem:[#allocation3 + $0x268] sm:$0xff] }
 0xef5   : > { %5188 = vmatpush1.bf16.msra.mxu1 %v5187_v26  ;;  %v5213_v26 = vpack.c.bf16 %v3083_v37, %v3081_v42  ;;  %v5215_v59 = vpack.c.bf16 %v3082_v30, %v3080_v53  ;;  %v3995_v41 = vld [vmem:[#allocation3 + $0x3b0] sm:$0xff]  ;;  %v5245_v42 = vpack.c.bf16 %v3487_v36, %v3485_v35  ;;  %v3484_v37 = vld [vmem:[#allocation3 + $0x240] sm:$0xff]  ;;  %v4098_v35 = vrot.slane %v6075_v25, 7 }
 0xef6   : > { %5190 = vmatprep.subr.bf16.mxu1 %v5189_v55  ;;  %v3085_v55 = vld [vmem:[#allocation3 + $0x168] sm:$0xff]  ;;  %v5291_v45 = vpack.c.bf16 %v3995_v41, %v3993_v51  ;;  %v3488_v53 = vld [vmem:[#allocation3 + $0x260] sm:$0xff]  ;;  %v3490_v30 = vld [vmem:[#allocation3 + $0x270] sm:$0xff] }
 0xef7   : > { %5228 = vmatpush1.bf16.msra.mxu0 %v5227_v50  ;;  %v3787_v50 = vld [vmem:[#allocation3 + $0x300] sm:$0xff]  ;;  %v5217_v63 = vpack.c.bf16 %v3087_v56, %v3085_v55  ;;  %v3689_v55 = vld [vmem:[#allocation3 + $0x2d8] sm:$0xff]  ;;  %v3997_v56 = vrot.slane %v6075_v25, 6 }
 0xef8   : > { %4722 = vmatmul.mubr.msk.f32.vlgmr.msra.gmra.mrb[18].mxu1 %vm1064_vm0, %v2684_v1  ;;  %5238 = vmatprep.subr.bf16.mxu0 %v5237_v61  ;;  %v3792_v61 = vld [vmem:[#allocation3 + $0x328] sm:$0xff]  ;;  %v5271_v5 = vpack.c.bf16 %v3789_v58, %v3787_v50  ;;  %v3688_v58 = vld [vmem:[#allocation3 + $0x2d0] sm:$0xff]  ;;  %v4208_v36 = vld [vmem:[%s6275_s0 + $0x80] sm:$0xff] }
 0xef9   : > { %5192 = vmatpush1.bf16.msra.mxu1 %v5191_v2  ;;  %2852 = vmatprep.mubr.f32.mxu1 %v5584_v0  ;;  %v3084_v2 = vld [vmem:[#allocation3 + $0x160] sm:$0xff]  ;;  %v3283_v1 = vld [vmem:[#allocation3 + $0x1c8] sm:$0xff]  ;;  %v5273_v6 = vpack.c.bf16 %v3794_v62, %v3792_v61  ;;  %v3693_v61 = vld [vmem:[#allocation3 + $0x2f8] sm:$0xff]  ;;  %v5263_v62 = vpack.c.bf16 %v3688_v58, %v3686_v40 }
 0xefa   : > { %4727 = vmatmul.mubr.msk.f32.vlgmr.msra.gmra.mrb[18].mxu0 %vm1064_vm0, %v3189_v15  ;;  %5194 = vmatprep.subr.bf16.mxu1 %v5193_v4  ;;  %v3285_v4 = vld [vmem:[#allocation3 + $0x1d8] sm:$0xff]  ;;  %v5219_v10 = vpack.c.bf16 %v3086_v3, %v3084_v2  ;;  %v3690_v2 = vld [vmem:[#allocation3 + $0x2e0] sm:$0xff]  ;;  %v3692_v3 = vld [vmem:[#allocation3 + $0x2f0] sm:$0xff] }
 0xefb   : > { %5240 = vmatpush1.bf16.msra.mxu0 %v5239_v12  ;;  %3458 = vmatprep.mubr.f32.mxu0 %v5584_v0  ;;  %v3791_v12 = vld [vmem:[#allocation3 + $0x320] sm:$0xff]  ;;  %v3992_v15 = vld [vmem:[#allocation3 + $0x398] sm:$0xff] }
 0xefc   : > { %5242 = vmatprep.subr.bf16.mxu0 %v5241_v44  ;;  %v5229_v44 = vpack.c.bf16 %v3285_v4, %v3283_v1  ;;  %v3891_v1 = vld [vmem:[#allocation3 + $0x358] sm:$0xff]  ;;  %v5267_v4 = vpack.c.bf16 %v3692_v3, %v3690_v2  ;;  %v4193_v41 = vld [vmem:[%s6275_s0 + $0x8] sm:$0xff]  ;;  %v4218_v2 = vld [vmem:[%s6275_s0 + $0xd0] sm:$0xff] }
 0xefd   : > { %5196 = vmatpush1.bf16.msra.mxu1 %v5195_v18  ;;  %v5275_v18 = vpack.c.bf16 %v3793_v14, %v3791_v12  ;;  %v3890_v12 = vld [vmem:[#allocation3 + $0x350] sm:$0xff]  ;;  %v3893_v14 = vld [vmem:[#allocation3 + $0x368] sm:$0xff]  ;;  %v4192_v51 = vld [vmem:[%s6275_s0] sm:$0xff] }
 0xefe   : > { %5198 = vmatprep.subr.bf16.mxu1 %v5197_v21  ;;  %v5285_v21 = vpack.c.bf16 %v3992_v15, %v3990_v9  ;;  %v3694_v15 = vrot.slane %v6075_v25, 3  ;;  %v4216_v58 = vld [vmem:[%s6275_s0 + $0xc0] sm:$0xff]  ;;  %v4219_v3 = vld [vmem:[%s6275_s0 + $0xd8] sm:$0xff] }
 0xeff   : > { %5244 = vmatpush1.bf16.msra.mxu0 %v5243_v23  ;;  %v5231_v23 = vpack.c.bf16 %v3284_v17, %v3282_v16  ;;  %v3892_v16 = vld [vmem:[#allocation3 + $0x360] sm:$0xff]  ;;  %v3894_v17 = vld [vmem:[#allocation3 + $0x370] sm:$0xff] }
 0xf00   : > { %4723 = vmatmul.mubr.msk.f32.vlgmr.msra.gmra.mrb[20].mxu1 %vm1064_vm0, %v2785_v38  ;;  %5254 = vmatprep.subr.bf16.mxu0 %v5253_v29  ;;  %v5233_v29 = vpack.c.bf16 %v3289_v20, %v3287_v19  ;;  %v3795_v38 = vrot.slane %v6075_v25, 4  ;;  %v4093_v19 = vld [vmem:[#allocation3 + $0x3d8] sm:$0xff]  ;;  %v5283_v20 = vpack.c.bf16 %v3894_v17, %v3892_v16  ;;  %v4206_v17 = vld [vmem:[%s6275_s0 + $0x70] sm:$0xff] }
 0xf01   : > { %5200 = vmatpush1.bf16.msra.mxu1 %v5199_v34  ;;  %2953 = vmatprep.mubr.f32.mxu1 %v5584_v0  ;;  %v5287_v34 = vpack.c.bf16 %v3991_v43, %v3989_v22  ;;  %v4090_v22 = vld [vmem:[#allocation3 + $0x3c0] sm:$0xff]  ;;  %v4092_v43 = vld [vmem:[#allocation3 + $0x3d0] sm:$0xff] }
 0xf02   : > { %4729 = vmatmul.mubr.msk.f32.vlgmr.msra.gmra.mrb[20].mxu0 %vm1064_vm0, %v6075_v25  ;;  %5202 = vmatprep.subr.bf16.mxu1 %v5201_v39  ;;  %v5289_v39 = vpack.c.bf16 %v3996_v27, %v3994_v24  ;;  %v4097_v24 = vld [vmem:[#allocation3 + $0x3f8] sm:$0xff]  ;;  %v5295_v27 = vpack.c.bf16 %v4092_v43, %v4090_v22  ;;  %v4308_v22 = vld [vmem:[%s6276_s20 + $0x8] sm:$0xff]  ;;  %v4309_v43 = vld [vmem:[%s6276_s20 + $0x10] sm:$0xff] }
 0xf03   : > { %5256 = vmatpush1.bf16.msra.mxu0 %v5255_v8  ;;  %3660 = vmatprep.mubr.f32.mxu0 %v5584_v0  ;;  %v5235_v8 = vpack.c.bf16 %v3288_v33, %v3286_v32  ;;  %v4094_v32 = vld [vmem:[#allocation3 + $0x3e0] sm:$0xff]  ;;  %v4096_v33 = vld [vmem:[#allocation3 + $0x3f0] sm:$0xff] }
 0xf04   : > { %5258 = vmatprep.subr.bf16.mxu0 %v5257_v7  ;;  %v3486_v7 = vld [vmem:[#allocation3 + $0x250] sm:$0xff] }
 0xf05   : > { %5204 = vmatpush1.bf16.msra.mxu1 %v5203_v47  ;;  %v3491_v47 = vld [vmem:[#allocation3 + $0x278] sm:$0xff]  ;;  %v5247_v48 = vpack.c.bf16 %v3486_v7, %v3484_v37 }
 0xf06   : > { %5214 = vmatprep.subr.bf16.mxu1 %v5213_v26  ;;  %v5249_v26 = vpack.c.bf16 %v3491_v47, %v3489_v46  ;;  %v4211_v37 = vld [vmem:[%s6275_s0 + $0x98] sm:$0xff]  ;;  %v4212_v47 = vld [vmem:[%s6275_s0 + $0xa0] sm:$0xff] }
 0xf07   : > { %5260 = vmatpush1.bf16.msra.mxu0 %v5259_v54  ;;  %v3687_v54 = vld [vmem:[#allocation3 + $0x2c8] sm:$0xff]  ;;  %v4223_v16 = vld [vmem:[%s6275_s0 + $0xf8] sm:$0xff] }
 0xf08   : > { %4724 = vmatmul.mubr.msk.f32.vlgmr.msra.gmra.mrb[22].mxu1 %vm1064_vm0, %v2886_v31  ;;  %5270 = vmatprep.subr.bf16.mxu0 %v5269_v57  ;;  %v5251_v57 = vpack.c.bf16 %v3490_v30, %v3488_v53  ;;  %v5261_v50 = vpack.c.bf16 %v3689_v55, %v3687_v54  ;;  %v3492_v31 = vrot.slane %v6075_v25, 1  ;;  %v4197_v53 = vld [vmem:[%s6275_s0 + $0x28] sm:$0xff]  ;;  %v4214_v54 = vld [vmem:[%s6275_s0 + $0xb0] sm:$0xff]  ;;  %v4215_v55 = vld [vmem:[%s6275_s0 + $0xb8] sm:$0xff] }
 0xf09   : > { %5216 = vmatpush1.bf16.msra.mxu1 %v5215_v59  ;;  %3155 = vmatprep.mubr.f32.mxu1 %v5584_v0  ;;  %v3691_v59 = vld [vmem:[#allocation3 + $0x2e8] sm:$0xff] }
 0xf0a   : > { %4731 = vmatmul.mubr.msk.f32.vlgmr.msra.gmra.mrb[22].mxu0 %vm1064_vm0, %v3593_v52  ;;  %5218 = vmatprep.subr.bf16.mxu1 %v5217_v63  ;;  %v5265_v63 = vpack.c.bf16 %v3693_v61, %v3691_v59  ;;  %v4217_v59 = vld [vmem:[%s6275_s0 + $0xc8] sm:$0xff] }
 0xf0b   : > { %5272 = vmatpush1.bf16.msra.mxu0 %v5271_v5  ;;  %3862 = vmatprep.mubr.f32.mxu0 %v5584_v0  ;;  %v3889_v5 = vld [vmem:[#allocation3 + $0x348] sm:$0xff]  ;;  %v5317_v61 = vpack.c.bf16 %v4217_v59, %v4216_v58 }
 0xf0c   : > { %5274 = vmatprep.subr.bf16.mxu0 %v5273_v6  ;;  %v5277_v52 = vpack.c.bf16 %v3891_v1, %v3889_v5  ;;  %v3888_v6 = vld [vmem:[#allocation3 + $0x340] sm:$0xff]  ;;  %v5321_v5 = vpack.c.bf16 %v4219_v3, %v4218_v2  ;;  %v4202_v1 = vld [vmem:[%s6275_s0 + $0x50] sm:$0xff] }
 0xf0d   : > { %5220 = vmatpush1.bf16.msra.mxu1 %v5219_v10  ;;  %v3895_v10 = vld [vmem:[#allocation3 + $0x378] sm:$0xff]  ;;  %v5279_v9 = vpack.c.bf16 %v3890_v12, %v3888_v6  ;;  %v4221_v12 = vld [vmem:[%s6275_s0 + $0xe8] sm:$0xff] }
 0xf0e   : > { %5230 = vmatprep.subr.bf16.mxu1 %v5229_v44  ;;  %v5281_v44 = vpack.c.bf16 %v3895_v10, %v3893_v14  ;;  %v4220_v6 = vld [vmem:[%s6275_s0 + $0xe0] sm:$0xff] }
 0xf0f   : > { %5276 = vmatpush1.bf16.msra.mxu0 %v5275_v18  ;;  %v4091_v18 = vld [vmem:[#allocation3 + $0x3c8] sm:$0xff]  ;;  %v5325_v14 = vpack.c.bf16 %v4221_v12, %v4220_v6  ;;  %v4204_v10 = vld [vmem:[%s6275_s0 + $0x60] sm:$0xff] }
 0xf10   : > { %4726 = vmatmul.mubr.msk.f32.vlgmr.msra.gmra.mrb[24].mxu1 %vm1064_vm0, %v3088_v28  ;;  %5286 = vmatprep.subr.bf16.mxu0 %v5285_v21  ;;  %v5293_v21 = vpack.c.bf16 %v4093_v19, %v4091_v18  ;;  %v3896_v28 = vrot.slane %v6075_v25, 5  ;;  %v4194_v25 = vld [vmem:[%s6275_s0 + $0x10] sm:$0xff]  ;;  %v4207_v19 = vld [vmem:[%s6275_s0 + $0x78] sm:$0xff] }
 0xf11   : > { %5232 = vmatpush1.bf16.msra.mxu1 %v5231_v23  ;;  %3357 = vmatprep.mubr.f32.mxu1 %v5584_v0  ;;  %v4095_v23 = vld [vmem:[#allocation3 + $0x3e8] sm:$0xff] }
 0xf12   : > { %4733 = vmatmul.mubr.msk.f32.vlgmr.msra.gmra.mrb[24].mxu0 %vm1064_vm0, %v3795_v38  ;;  %5234 = vmatprep.subr.bf16.mxu1 %v5233_v29  ;;  %v5297_v29 = vpack.c.bf16 %v4097_v24, %v4095_v23  ;;  %v4209_v38 = vld [vmem:[%s6275_s0 + $0x88] sm:$0xff]  ;;  %v5590_v23 = vmov 0.0|0.0  }
 0xf13   : > { %5288 = vmatpush1.bf16.msra.mxu0 %v5287_v34  ;;  %4064 = vmatprep.mubr.f32.mxu0 %v5584_v0  ;;  %v5299_v34 = vpack.c.bf16 %v4096_v33, %v4094_v32  ;;  %v4312_v32 = vld [vmem:[%s6276_s20 + $0x28] sm:$0xff] }
 0xf14   : > { %5290 = vmatprep.subr.bf16.mxu0 %v5289_v39  ;;  %v5301_v39 = vpack.c.bf16 %v4209_v38, %v4208_v36  ;;  %v4315_v38 = vld [vmem:[%s6276_s20 + $0x40] sm:$0xff] }
 0xf15   : > { %5236 = vmatpush1.bf16.msra.mxu1 %v5235_v8  ;;  %v5303_v8 = vpack.c.bf16 %v4193_v41, %v4192_v51  ;;  %v4317_v41 = vld [vmem:[%s6276_s20 + $0x50] sm:$0xff] }
 0xf16   : > { %5246 = vmatprep.subr.bf16.mxu1 %v5245_v42  ;;  %v4210_v42 = vld [vmem:[%s6275_s0 + $0x90] sm:$0xff] }
 0xf17   : > { %5292 = vmatpush1.bf16.msra.mxu0 %v5291_v45  ;;  %v5305_v7 = vpack.c.bf16 %v4211_v37, %v4210_v42  ;;  %v4195_v45 = vld [vmem:[%s6275_s0 + $0x18] sm:$0xff]  ;;  %v5591_v37 = vmov 1966171168  }
 0xf18   : > { %4728 = vmatmul.mubr.msk.f32.vlgmr.msra.gmra.mrb[26].mxu1 %vm1064_vm0, %v3290_v49  ;;  %5302 = vmatprep.subr.bf16.mxu0 %v5301_v39  ;;  %v5307_v46 = vpack.c.bf16 %v4195_v45, %v4194_v25  ;;  %v4316_v39 = vld [vmem:[%s6276_s20 + $0x48] sm:$0xff] }
 0xf19   : > { %5248 = vmatpush1.bf16.msra.mxu1 %v5247_v48  ;;  %3559 = vmatprep.mubr.f32.mxu1 %v5584_v0  ;;  %v4213_v48 = vld [vmem:[%s6275_s0 + $0xa8] sm:$0xff]  ;;  %v5346_v51 = vpack.c.bf16 %v4316_v39, %v4315_v38 }
 0xf1a   : > { %4735 = vmatmul.mubr.msk.f32.vlgmr.msra.gmra.mrb[26].mxu0 %vm1064_vm0, %v3997_v56  ;;  %5250 = vmatprep.subr.bf16.mxu1 %v5249_v26  ;;  %v5309_v49 = vpack.c.bf16 %v4213_v48, %v4212_v47  ;;  %v4196_v26 = vld [vmem:[%s6275_s0 + $0x20] sm:$0xff]  ;;  %v5313_v56 = vpack.c.bf16 %v4215_v55, %v4214_v54 }
 0xf1b   : > { %5304 = vmatpush3.bf16.msra.mxu0 %v5303_v8  ;;  %v5311_v30 = vpack.c.bf16 %v4197_v53, %v4196_v26  ;;  %v4318_v8 = vld [vmem:[%s6276_s20 + $0x58] sm:$0xff] }
 0xf1c   : > { %5306 = vmatprep.subr.bf16.mxu0 %v5305_v7  ;;  %v5349_v42 = vpack.c.bf16 %v4318_v8, %v4317_v41  ;;  %v2661_v7 = vunpack.c.l.s4 %v5591_v37 }
 0xf1d   : > { %5252 = vmatpush1.bf16.msra.mxu1 %v5251_v57  ;;  %v4198_v57 = vld [vmem:[%s6275_s0 + $0x30] sm:$0xff] }
 0xf1e   : > { %5262 = vmatprep.subr.bf16.mxu1 %v5261_v50  ;;  %v4199_v50 = vld [vmem:[%s6275_s0 + $0x38] sm:$0xff]  ;;  %v2662_v25 = vunpack.c.0.s8 %v2661_v7 }
 0xf1f   : > { %5308 = vmatpush3.bf16.msra.mxu0 %v5307_v46  ;;  %v5315_v40 = vpack.c.bf16 %v4199_v50, %v4198_v57 }
 0xf20   : > { %4730 = vmatmul.mubr.msk.f32.vlgmr.msra.gmra.mrb[28].mxu1 %vm1064_vm0, %v3492_v31  ;;  %5310 = vmatprep.subr.bf16.mxu0 %v5309_v49  ;;  %v4201_v31 = vld [vmem:[%s6275_s0 + $0x48] sm:$0xff]  ;;  %v6163_v47 = vsub.s32 %v2662_v25, %v5874_v60  ;;  %v4395_v60 = vld [vmem:[%s6278_s7] sm:$0xff] }
 0xf21   : > { %5264 = vmatpush1.bf16.msra.mxu1 %v5263_v62  ;;  %3761 = vmatprep.mubr.f32.mxu1 %v5584_v0  ;;  %v4200_v62 = vld [vmem:[%s6275_s0 + $0x40] sm:$0xff] }
 0xf22   : > { %5266 = vmatprep.subr.bf16.mxu1 %v5265_v63  ;;  %v5319_v63 = vpack.c.bf16 %v4201_v31, %v4200_v62 }
 0xf23   : > { %5312 = vmatpush3.bf16.msra.mxu0 %v5311_v30 }
 0xf24   : > { %5314 = vmatprep.subr.bf16.mxu0 %v5313_v56 }
 0xf25   : > { %5268 = vmatpush1.bf16.msra.mxu1 %v5267_v4  ;;  %v4203_v4 = vld [vmem:[%s6275_s0 + $0x58] sm:$0xff] }
 0xf26   : > { %5278 = vmatprep.subr.bf16.mxu1 %v5277_v52  ;;  %v5323_v52 = vpack.c.bf16 %v4203_v4, %v4202_v1 }
 0xf27   : > { %5316 = vmatpush3.bf16.msra.mxu0 %v5315_v40  ;;  %v2574_v40 = vld [vmem:[%s6277_s2] sm:$0x3] }
 0xf28   : > { %4732 = vmatmul.mubr.msk.f32.vlgmr.msra.gmra.mrb[30].mxu1 %vm1064_vm0, %v3694_v15  ;;  %5318 = vmatprep.subr.bf16.mxu0 %v5317_v61 }
 0xf29   : > { %5280 = vmatpush1.bf16.msra.mxu1 %v5279_v9  ;;  %3963 = vmatprep.mubr.f32.mxu1 %v5584_v0  ;;  %v4205_v9 = vld [vmem:[%s6275_s0 + $0x68] sm:$0xff] }
 0xf2a   : > { %5282 = vmatprep.subr.bf16.mxu1 %v5281_v44  ;;  %v5327_v15 = vpack.c.bf16 %v4205_v9, %v4204_v10  ;;  %v4222_v44 = vld [vmem:[%s6275_s0 + $0xf0] sm:$0xff] }
 0xf2b   : > { %5320 = vmatpush3.bf16.msra.mxu0 %v5319_v63  ;;  %v5329_v18 = vpack.c.bf16 %v4223_v16, %v4222_v44 }
 0xf2c   : > { %5322 = vmatprep.subr.bf16.mxu0 %v5321_v5 }
 0xf2d   : > { %5284 = vmatpush1.bf16.msra.mxu1 %v5283_v20  ;;  %v5331_v20 = vpack.c.bf16 %v4207_v19, %v4206_v17 }
 0xf2e   : > { %5294 = vmatprep.subr.bf16.mxu1 %v5293_v21  ;;  %v4307_v21 = vld [vmem:[%s6276_s20] sm:$0xff] }
 0xf2f   : > { %5324 = vmatpush3.bf16.msra.mxu0 %v5323_v52  ;;  %v5334_v24 = vpack.c.bf16 %v4308_v22, %v4307_v21 }
 0xf30   : > { %4734 = vmatmul.mubr.msk.f32.vlgmr.msra.gmra.mrb[32].mxu1 %vm1064_vm0, %v3896_v28  ;;  %5326 = vmatprep.subr.bf16.mxu0 %v5325_v14 }
 0xf31   : > { %5296 = vmatpush1.bf16.msra.mxu1 %v5295_v27  ;;  %4165 = vmatprep.mubr.f32.mxu1 %v5584_v0  ;;  %v4310_v27 = vld [vmem:[%s6276_s20 + $0x18] sm:$0xff] }
 0xf32   : > { %5298 = vmatprep.subr.bf16.mxu1 %v5297_v29  ;;  %v5337_v28 = vpack.c.bf16 %v4310_v27, %v4309_v43  ;;  %v4311_v29 = vld [vmem:[%s6276_s20 + $0x20] sm:$0xff] }
 0xf33   : > { %5328 = vmatpush3.bf16.msra.mxu0 %v5327_v15  ;;  %v5340_v33 = vpack.c.bf16 %v4312_v32, %v4311_v29 }
 0xf34   : > { %5330 = vmatprep.subr.bf16.mxu0 %v5329_v18 }
 0xf35   : > { %5300 = vmatpush1.bf16.msra.mxu1 %v5299_v34  ;;  %v4313_v34 = vld [vmem:[%s6276_s20 + $0x30] sm:$0xff] }
 0xf36   : > { %5333 = vmatprep.subr.bf16.mxu1 %v5590_v23 }
 0xf37   : > { %5332 = vmatpush3.bf16.msra.mxu0 %v5331_v20 }
 0xf38   : > { %4736 = vmatmul.mubr.msk.f32.vlgmr.msra.gmra.mrb[34].mxu1 %vm1064_vm0, %v4098_v35  ;;  %5357 = vmatprep.subr.bf16.mxu0 %v5590_v23  ;;  %v4314_v35 = vld [vmem:[%s6276_s20 + $0x38] sm:$0xff] }
 0xf39   : > { %5335 = vmatpush3.bf16.msra.mxu1 %v5334_v24  ;;  %v5343_v36 = vpack.c.bf16 %v4314_v35, %v4313_v34  ;;  %5032 = vmatprep.mubr.msk.f32.mxu1 %vm5592_vm7, %v5584_v0 }
 0xf3a   : > { %5336 = vmatprep.subr.bf16.mxu1 %v5590_v23 }
 0xf3d   : > { %5338 = vmatpush3.bf16.msra.mxu1 %v5337_v28 }
 0xf3e   : > { %5339 = vmatprep.subr.bf16.mxu1 %v5590_v23 }
 0xf41   : > { %5341 = vmatpush3.bf16.msra.mxu1 %v5340_v33 }
 0xf42   : > { %5342 = vmatprep.subr.bf16.mxu1 %v5590_v23 }
 0xf45   : > { %5344 = vmatpush3.bf16.msra.mxu1 %v5343_v36 }
 0xf46   : > { %5345 = vmatprep.subr.bf16.mxu1 %v5590_v23 }
 0xf49   : > { %5347 = vmatpush3.bf16.msra.mxu1 %v5346_v51 }
 0xf4a   : > { %5348 = vmatprep.subr.bf16.mxu1 %v5590_v23 }
 0xf4d   : > { %5350 = vmatpush3.bf16.msra.mxu1 %v5349_v42 }
 0xf4e   : > { %5351 = vmatprep.subr.bf16.mxu1 %v5590_v23 }
 0xfc3   : > { %v2652_v45 = vpop.f32.mrb[16].mxu1 }
 0xfc4   : > { %v2654_v46 = vpop.f32.mrb[17].mxu1 }
 0xfc5   : > { %v2659_v48 = vcombine.low %v2652_v45, %v2654_v46  ;;  %v3056_v49 = vpop.f32.mrb[16].mxu0 }
 0xfc6   : > { %v3058_v26 = vpop.f32.mrb[17].mxu0 }
 0xfc7   : > { %v3063_v53 = vcombine.low %v3056_v49, %v3058_v26  ;;  %v2666_v30 = vrot.slane %v2659_v48, %v6163_v47 }
 0xfc9   : > { %v2673_v56 = vrot.slane %v2666_v30, %v6163_v47  ;;  %v3070_v17 = vrot.slane %v3063_v53, %v6163_v47 }
 0xfcb   : > { %v2753_v54 = vpop.f32.mrb[18].mxu1  ;;  %v2675_v62 = vadd.f32 %v2673_v56, %v2574_v40  ;;  %v3077_v21 = vrot.slane %v3070_v17, %v6163_v47 }
 0xfcc   : > { %v2755_v55 = vpop.f32.mrb[19].mxu1 }
 0xfcd   : > { %v2760_v57 = vcombine.low %v2753_v54, %v2755_v55  ;;  %v3258_v50 = vpop.f32.mrb[18].mxu0 }
 0xfce   : > { %v3260_v58 = vpop.f32.mrb[19].mxu0 }
 0xfcf   : > { %v2767_v59 = vrot.slane %v2760_v57, %v6163_v47  ;;  %v3265_v61 = vcombine.low %v3258_v50, %v3260_v58 }
 0xfd1   : > { %v2774_v31 = vrot.slane %v2767_v59, %v6163_v47  ;;  %v3272_v33 = vrot.slane %v3265_v61, %v6163_v47 }
 0xfd3   : > { %v2776_v63 = vadd.f32 %v2774_v31, %v2675_v62  ;;  %v2854_v2 = vpop.f32.mrb[20].mxu1  ;;  %v3279_v38 = vrot.slane %v3272_v33, %v6163_v47  ;;  %v4322_v33 = vld [vmem:[%s6276_s20 + $0x78] sm:$0xff] }
 0xfd4   : > { %v2856_v3 = vpop.f32.mrb[21].mxu1 }
 0xfd5   : > { %v2861_v5 = vcombine.low %v2854_v2, %v2856_v3  ;;  %v3460_v1 = vpop.f32.mrb[20].mxu0 }
 0xfd6   : > { %v3462_v4 = vpop.f32.mrb[21].mxu0 }
 0xfd7   : > { %v2868_v52 = vrot.slane %v2861_v5, %v6163_v47  ;;  %v3467_v6 = vcombine.low %v3460_v1, %v3462_v4 }
 0xfd9   : > { %v2875_v12 = vrot.slane %v2868_v52, %v6163_v47  ;;  %v3474_v25 = vrot.slane %v3467_v6, %v6163_v47 }
 0xfdb   : > { %v2877_v14 = vadd.f32 %v2875_v12, %v2776_v63  ;;  %v2955_v10 = vpop.f32.mrb[22].mxu1  ;;  %v3481_v49 = vrot.slane %v3474_v25, %v6163_v47 }
 0xfdc   : > { %v2957_v9 = vpop.f32.mrb[23].mxu1 }
 0xfdd   : > { %v2962_v15 = vcombine.low %v2955_v10, %v2957_v9  ;;  %v3662_v44 = vpop.f32.mrb[22].mxu0 }
 0xfde   : > { %v3664_v16 = vpop.f32.mrb[23].mxu0 }
 0xfdf   : > { %v2969_v18 = vrot.slane %v2962_v15, %v6163_v47  ;;  %v3669_v19 = vcombine.low %v3662_v44, %v3664_v16 }
 0xfe1   : > { %v2976_v20 = vrot.slane %v2969_v18, %v6163_v47  ;;  %v3676_v56 = vrot.slane %v3669_v19, %v6163_v47 }
 0xfe3   : > { %v2978_v22 = vadd.f32 %v2976_v20, %v2877_v14  ;;  %v3157_v43 = vpop.f32.mrb[24].mxu1  ;;  %v3683_v40 = vrot.slane %v3676_v56, %v6163_v47  ;;  %v4480_v56 = vld [vmem:[%s6281_s16 + $0x8] sm:$0xff] }
 0xfe4   : > { %v3159_v24 = vpop.f32.mrb[25].mxu1 }
 0xfe5   : > { %v3079_v27 = vadd.f32 %v3077_v21, %v2978_v22  ;;  %v3164_v28 = vcombine.low %v3157_v43, %v3159_v24  ;;  %v3864_v29 = vpop.f32.mrb[24].mxu0 }
 0xfe6   : > { %v3866_v32 = vpop.f32.mrb[25].mxu0 }
 0xfe7   : > { %v3171_v34 = vrot.slane %v3164_v28, %v6163_v47  ;;  %v3871_v35 = vcombine.low %v3864_v29, %v3866_v32  ;;  %v4319_v28 = vld [vmem:[%s6276_s20 + $0x60] sm:$0xff]  ;;  %v4320_v29 = vld [vmem:[%s6276_s20 + $0x68] sm:$0xff] }
 0xfe8   : > { %v5352_v32 = vpack.c.bf16 %v4320_v29, %v4319_v28 }
 0xfe9   : > { %v3178_v36 = vrot.slane %v3171_v34, %v6163_v47  ;;  %v3878_v63 = vrot.slane %v3871_v35, %v6163_v47  ;;  %v4397_v34 = vld [vmem:[%s6278_s7 + $0x10] sm:$0xff] }
 0xfea   : > { %5353 = vmatpush3.bf16.msra.mxu1 %v5352_v32 }
 0xfeb   : > { %v3180_v39 = vadd.f32 %v3178_v36, %v3079_v27  ;;  %v3359_v51 = vpop.f32.mrb[26].mxu1  ;;  %v3885_v5 = vrot.slane %v3878_v63, %v6163_v47  ;;  %5354 = vmatprep.subr.bf16.mxu1 %v5590_v23  ;;  %v4398_v36 = vld [vmem:[%s6278_s7 + $0x18] sm:$0xff] }
 0xfec   : > { %v3361_v41 = vpop.f32.mrb[27].mxu1 }
 0xfed   : > { %v3281_v8 = vadd.f32 %v3279_v38, %v3180_v39  ;;  %v3366_v42 = vcombine.low %v3359_v51, %v3361_v41  ;;  %v4066_v37 = vpop.f32.mrb[26].mxu0  ;;  %v5361_v38 = vpack.c.bf16 %v4398_v36, %v4397_v34  ;;  %v4399_v39 = vld [vmem:[%s6278_s7 + $0x20] sm:$0xff]  ;;  %v4400_v51 = vld [vmem:[%s6278_s7 + $0x28] sm:$0xff] }
 0xfee   : > { %v4068_v7 = vpop.f32.mrb[27].mxu0  ;;  %v5364_v41 = vpack.c.bf16 %v4400_v51, %v4399_v39 }
 0xfef   : > { %v3373_v45 = vrot.slane %v3366_v42, %v6163_v47  ;;  %v4073_v46 = vcombine.low %v4066_v37, %v4068_v7  ;;  %v4224_v42 = vld [vmem:[%s6279_s10] sm:$0x1] }
 0xff1   : > { %v3380_v48 = vrot.slane %v3373_v45, %v6163_v47  ;;  %v4080_v14 = vrot.slane %v4073_v46, %v6163_v47  ;;  %v4401_v46 = vld [vmem:[%s6278_s7 + $0x30] sm:$0xff] }
 0xff3   : > { %v3382_v26 = vadd.f32 %v3380_v48, %v3281_v8  ;;  %v3561_v53 = vpop.f32.mrb[28].mxu1  ;;  %v4087_v15 = vrot.slane %v4080_v14, %v6163_v47  ;;  %v4402_v48 = vld [vmem:[%s6278_s7 + $0x38] sm:$0xff] }
 0xff4   : > { %v3563_v30 = vpop.f32.mrb[29].mxu1 }
 0xff5   : > { %v3483_v54 = vadd.f32 %v3481_v49, %v3382_v26  ;;  %v3568_v55 = vcombine.low %v3561_v53, %v3563_v30  ;;  %v5367_v49 = vpack.c.bf16 %v4402_v48, %v4401_v46  ;;  %v4323_v26 = vld [vmem:[%s6280_s15] sm:$0x1] }
 0xff7   : > { %v3575_v57 = vrot.slane %v3568_v55, %v6163_v47  ;;  %v4479_v55 = vld [vmem:[%s6281_s16] sm:$0xff] }
 0xff9   : > { %v3582_v50 = vrot.slane %v3575_v57, %v6163_v47  ;;  %v5370_v57 = vpack.c.bf16 %v4480_v56, %v4479_v55 }
 0xffb   : > { %v3584_v58 = vadd.f32 %v3582_v50, %v3483_v54  ;;  %v3763_v59 = vpop.f32.mrb[30].mxu1  ;;  %v4403_v50 = vld [vmem:[%s6282_s23] sm:$0x1] }
 0xffc   : > { %v3765_v61 = vpop.f32.mrb[31].mxu1 }
 0xffd   : > { %v3685_v62 = vadd.f32 %v3683_v40, %v3584_v58  ;;  %v3770_v31 = vcombine.low %v3763_v59, %v3765_v61  ;;  %v4481_v61 = vld [vmem:[%s5746_s4] sm:$0x1] }
 0xfff   : > { %v3777_v2 = vrot.slane %v3770_v31, %v6163_v47 }
0x1001   : > { %v3784_v3 = vrot.slane %v3777_v2, %v6163_v47  ;;  %v4556_v2 = vld [vmem:[%s5751_s6] sm:$0x1] }
0x1003   : > { %v3786_v1 = vadd.f32 %v3784_v3, %v3685_v62  ;;  %v3965_v4 = vpop.f32.mrb[32].mxu1 }
0x1004   : > { %v3967_v52 = vpop.f32.mrb[33].mxu1 }
0x1005   : > { %v3887_v6 = vadd.f32 %v3885_v5, %v3786_v1  ;;  %v3972_v12 = vcombine.low %v3965_v4, %v3967_v52  ;;  %v4562_v4 = vld [vmem:[#allocation2] sm:$0x1] }
0x1007   : > { %v3979_v10 = vrot.slane %v3972_v12, %v6163_v47 }
0x1009   : > { %v3986_v9 = vrot.slane %v3979_v10, %v6163_v47 }
0x100b   : > { %v3988_v44 = vadd.f32 %v3986_v9, %v3887_v6  ;;  %v4167_v16 = vpop.f32.mrb[34].mxu1 }
0x100c   : > { %v4169_v17 = vpop.f32.mrb[35].mxu1 }
0x100d   : > { %v4174_v18 = vcombine.low %v4167_v16, %v4169_v17  ;;  %v4089_v19 = vadd.f32 %v4087_v15, %v3988_v44 }
0x100f   : > { %v4181_v20 = vrot.slane %v4174_v18, %v6163_v47 }
0x1011   : > { %v4188_v21 = vrot.slane %v4181_v20, %v6163_v47  ;;  %v4321_v47 = vld [vmem:[%s6276_s20 + $0x70] sm:$0xff] }
0x1013   : > { %v4190_v22 = vadd.f32 %v4188_v21, %v4089_v19 }
0x1015   : > { %v4191_v43 = vmax.f32 %v4190_v22, 0.0 }
0x1017   : > { %v4233_v24 = vrot.slane %v4191_v43, %v2323_v13  ;;  %v4229_v27 = vrot.slane %v4191_v43, %v2319_v11  ;;  %v5355_v13 = vpack.c.bf16 %v4322_v33, %v4321_v47  ;;  %v4396_v11 = vld [vmem:[%s6278_s7 + $0x8] sm:$0xff] }
0x1018   : > { %v5358_v35 = vpack.c.bf16 %v4396_v11, %v4395_v60 }
0x1019   : > { %4300 = vmatprep.mubr.f32.mxu0 %v4233_v24  ;;  %5356 = vmatpush3.bf16.msra.mxu1 %v5355_v13 }
0x101a   : > { %4301 = vmatmul.mubr.f32.vlgmr.msra.gmra.mrb[28].mxu0 %v4229_v27  ;;  %5369 = vmatprep.subr.bf16.mxu1 %v5590_v23 }
0x101b   : > { %5051 = vmatprep.mubr.msk.f32.mxu0 %vm5592_vm7, %v5584_v0  ;;  %5359 = vmatpush3.bf16.msra.mxu0 %v5358_v35 }
0x101c   : > { %5360 = vmatprep.subr.bf16.mxu0 %v5590_v23 }
0x101f   : > { %5362 = vmatpush3.bf16.msra.mxu0 %v5361_v38 }
0x1020   : > { %5363 = vmatprep.subr.bf16.mxu0 %v5590_v23 }
0x1023   : > { %5365 = vmatpush3.bf16.msra.mxu0 %v5364_v41 }
0x1024   : > { %5366 = vmatprep.subr.bf16.mxu0 %v5590_v23 }
0x1027   : > { %5368 = vmatpush3.bf16.msra.mxu0 %v5367_v49 }
0x10ed   : > { %v4868_v8 = vpop.f32.mrb[28].mxu0 }
0x10ee   : > { %v4869_v37 = vpop.f32.mrb[29].mxu0 }
0x10ef   : > { %v4870_v7 = vadd.f32 %v4869_v37, %v4868_v8 }
0x10f1   : > { %v4303_v25 = vadd.f32 %v4870_v7, %v4224_v42 }
0x10f3   : > { %v4306_v45 = vmax.f32 %v4303_v25, 0.0 }
0x10f5   : > { %5033 = vmatmul.mubr.f32.vlgmr.msra.gmra.mrb[36].mxu1 %v4306_v45 }
0x10f6   : > { %5058 = vmatprep.mubr.msk.f32.mxu1 %vm5592_vm7, %v5584_v0  ;;  %5371 = vmatpush3.bf16.msra.mxu1 %v5370_v57 }
0x11c8   : > { %v4390_v53 = vpop.f32.mrb[36].mxu1 }
0x11c9   : > { %v4391_v23 = vadd.f32 %v4390_v53, %v4323_v26  ;;  %v5034_v30 = vpop.f32.mrb[37].mxu1 }
0x11cb   : > { %v4394_v54 = vmax.f32 %v4391_v23, 0.0 }
0x11cd   : > { %5052 = vmatmul.mubr.msk.f32.vlgmr.msra.gmra.mrb[30].mxu0 %vm4404_vm8, %v4394_v54 }
0x12a0   : > { %v4474_v0 = vpop.f32.mrb[30].mxu0 }
0x12a1   : > { %v4475_v40 = vadd.f32 %v4474_v0, %v4403_v50  ;;  %v5053_v58 = vpop.f32.mrb[31].mxu0 }
0x12a3   : > { %v4478_v59 = vmax.f32 %v4475_v40, 0.0 }
0x12a5   : > { %5059 = vmatmul.mubr.msk.f32.vlgmr.msra.gmra.mrb[38].mxu1 %vm1419_vm5, %v4478_v59 }
0x1378   : > { %v4551_v62 = vpop.f32.mrb[38].mxu1 }
0x1379   : > { %v4552_v31 = vadd.f32 %v4551_v62, %v4481_v61  ;;  %v5060_v63 = vpop.f32.mrb[39].mxu1 }
0x137b   : > { %v4555_v3 = vmax.f32 %v4552_v31, 0.0 }
0x137d   : > { %v4557_v5 = vmul.f32 %v4556_v2, %v4555_v3 }
0x137f   : > { %v4559_v1 = vsel %vm4558_vm9, %v4557_v5, 0.0 }
0x1380   : > { %4560 = vadd.xlane.f32.xlu1 %v4559_v1 }
0x140d   : > { %v4561_v52 = vpop.xlane.xlu1 %4560 }
0x140e   : > { %v4563_v6 = vadd.f32 %v4562_v4, %v4561_v52 }
0x1410   : > { %4565 = vst.msk [vmem:[%s1013_s22] sm:$0x1] %vm4564_vm10, %v4563_v6 }
0x1411 PF: > { %s78_s28 = sadd.s32 1, %s5545_s28  }
0x1412   : > { %p75_p5 = scmp.ge.s32.totalorder %s78_s28, 4  }
0x1414   :  { %77 = sbr.rel (!%p75_p5) target bundleno = 58 (0x3a), region = 218 }
0x141b   :  { %4583 = vsyncpa [#allocation4], 1 }
0x141c   :  { %4585 = vsyncpa [#allocation4 + $0x1], 1 }

</bundles_post_ra>
